<compile_context>
chip_gen: v6e
topology: v6e:2x2x1
jax: 0.10.0
libtpu: 0.0.40
codegen_flags: <defaults>
</compile_context>

<pallas_src>
import functools

import jax
import jax.numpy as jnp
from jax.experimental import pallas as pl
from jax.experimental.pallas import tpu as pltpu  # noqa: F401  (TPU backend assumed)


# ------------------------------ Slab layout ---------------------------------
def _round8(n):
    return -(-n // 8) * 8


def _slab_layout(D, H, C, num_layers):
    """Static row offsets (all multiples of 8 sublanes) into the packed slab."""
    offs = {}
    row = 0
    offs["wih0"] = row; row += _round8(D)          # (D, 4H)
    offs["whh0"] = row; row += _round8(H)          # (H, 4H)
    offs["b0"] = row;   row += 8                   # (1, 4H) (padded rows)
    offs["up"] = []
    for _ in range(1, num_layers):
        o_w = row; row += _round8(2 * H)           # (2H, 4H) concat weight
        o_b = row; row += 8                        # (1, 4H)
        offs["up"].append((o_w, o_b))
    offs["wout"] = row; row += _round8(H)          # (H, 4H)  cols >= C are zero
    offs["bout"] = row; row += 8                   # (1, 4H)  cols >= C are zero
    total = _round8(row)
    return offs, total, 4 * H


def pack_params(params):
    """ONE-TIME packing of all weights into a single (N, 4H) f32 VMEM slab.

    Also pre-scales the g-gate columns by 2 so the kernel can use
    tanh(x) = 2*sigmoid(2x) - 1 (single EUP pass per gate vreg).
    `params` is left untouched (the pure-JAX reference uses the originals).
    """
    layers = params["layers"]
    num_layers = len(layers)
    D = layers[0]["w_ih_t"].shape[0]
    H = layers[0]["w_hh_t"].shape[0]
    C = params["w_out_t"].shape[1]
    offs, total, G = _slab_layout(D, H, C, num_layers)

    def scale_g(m):                       # double g-gate columns [2H, 3H)
        m = jnp.asarray(m, jnp.float32)
        return m.at[..., 2 * H:3 * H].multiply(2.0)

    slab = jnp.zeros((total, G), jnp.float32)
    slab = slab.at[offs["wih0"]:offs["wih0"] + D, :].set(scale_g(layers[0]["w_ih_t"]))
    slab = slab.at[offs["whh0"]:offs["whh0"] + H, :].set(scale_g(layers[0]["w_hh_t"]))
    slab = slab.at[offs["b0"]:offs["b0"] + 1, :].set(scale_g(layers[0]["bias"]))
    for i, lp in enumerate(layers[1:]):
        w_cat = jnp.concatenate([lp["w_ih_t"], lp["w_hh_t"]], axis=0)   # (2H, 4H)
        o_w, o_b = offs["up"][i]
        slab = slab.at[o_w:o_w + 2 * H, :].set(scale_g(w_cat))
        slab = slab.at[o_b:o_b + 1, :].set(scale_g(lp["bias"]))
    slab = slab.at[offs["wout"]:offs["wout"] + H, 0:C].set(
        jnp.asarray(params["w_out_t"], jnp.float32))
    slab = slab.at[offs["bout"]:offs["bout"] + 1, 0:C].set(
        jnp.asarray(params["b_out"], jnp.float32))
    return slab


# ------------------------- Fused LSTM + Linear kernel ------------------------
def _make_fused_kernel(num_layers, B, T, D, H, C, offs, G):
    """Kernel refs: x_ref (T*B, D) rows ordered (t, b); w_ref (N, 4H) slab;
    out_ref (B, C)."""

    def kernel(x_ref, w_ref, out_ref):
        f32 = jnp.float32

        # Hoisted gate-select lane mask: lanes [2H, 3H) are the 'g' gate.
        lane = jax.lax.broadcasted_iota(jnp.int32, (B, G), 1)
        g_mask = (lane >= 2 * H) & (lane < 3 * H)

        def lstm_cell(gates, c_prev):
            # g-gate pre-activations were pre-scaled by 2 at pack time, so
            # tanh(g) == 2*sigmoid(2g) - 1: a single full-vreg EUP pass.
            sig = jax.nn.sigmoid(gates)
            act = jnp.where(g_mask, 2.0 * sig - 1.0, sig)   # activated [i,f,g,o]
            i_g = act[:, 0 * H:1 * H]
            f_g = act[:, 1 * H:2 * H]
            g_g = act[:, 2 * H:3 * H]
            o_g = act[:, 3 * H:4 * H]
            c_new = f_g * c_prev + i_g * g_g
            h_new = o_g * jnp.tanh(c_new)
            return h_new, c_new

        # Static (8-sublane aligned) slices into the packed weight slab.
        wih0 = w_ref[offs["wih0"]:offs["wih0"] + D, :]        # (D, 4H)
        whh0 = w_ref[offs["whh0"]:offs["whh0"] + H, :]        # (H, 4H)
        b0 = w_ref[offs["b0"]:offs["b0"] + 1, :]              # (1, 4H)
        w_cat = [w_ref[o_w:o_w + 2 * H, :] for (o_w, _) in offs["up"]]
        # Bias broadcasts hoisted out of the time loop (JAX does not CSE them).
        b_up = [jnp.broadcast_to(w_ref[o_b:o_b + 1, :], (B, G))
                for (_, o_b) in offs["up"]]
        wout = w_ref[offs["wout"]:offs["wout"] + H, :]        # (H, 4H), cols>=C zero
        bout = w_ref[offs["bout"]:offs["bout"] + 1, :]        # (1, 4H), cols>=C zero

        # ---- Layer 0: input projection hoisted out of the recurrence ----
        # ONE (T*B, D) x (D, 4H) MXU op for all timesteps; bias folded once.
        x = x_ref[...].astype(f32)                            # (T*B, D), (t,b) rows
        xp0 = jnp.dot(x, wih0, preferred_element_type=f32) + b0   # (T*B, 4H)

        h = [jnp.zeros((B, H), f32) for _ in range(num_layers)]
        c = [jnp.zeros((B, H), f32) for _ in range(num_layers)]

        # Fully-unrolled time loop; (h, c) stay in vregs for the whole
        # recurrence.  Per-step xp0 slice is a contiguous sublane slice
        # thanks to the (t, b) row ordering.
        for t in range(T):
            gates0 = xp0[t * B:(t + 1) * B, :] + jnp.dot(
                h[0], whh0, preferred_element_type=f32)
            h[0], c[0] = lstm_cell(gates0, c[0])
            for l in range(1, num_layers):
                inp = jnp.concatenate([h[l - 1], h[l]], axis=-1)   # (B, 2H)
                gates = jnp.dot(inp, w_cat[l - 1],
                                preferred_element_type=f32) + b_up[l - 1]
                h[l], c[l] = lstm_cell(gates, c[l])

        # ---- Fused Linear head on r_out[:, -1, :] ----
        # wout/bout are zero-padded beyond column C, so the padded result
        # columns are exact zeros; keep only the first C lanes.
        res = jnp.dot(h[num_layers - 1], wout, preferred_element_type=f32) + bout
        out_ref[...] = res[:, :C].astype(out_ref.dtype)

    return kernel


def _fused_forward(x2d, slab, *, B, T, D, H, C, num_layers):
    offs, _, G = _slab_layout(D, H, C, num_layers)
    kernel = _make_fused_kernel(num_layers, B, T, D, H, C, offs, G)
    # Grid-less call: two inputs only (activations + packed weight slab),
    # both fully VMEM-resident.
    return pl.pallas_call(
        kernel,
        out_shape=jax.ShapeDtypeStruct((B, C), jnp.float32),
        in_specs=[pl.BlockSpec(x2d.shape, lambda: (0, 0)),
                  pl.BlockSpec(slab.shape, lambda: (0, 0))],
        out_specs=pl.BlockSpec((B, C), lambda: (0, 0)),
    )(x2d, slab)


# --------------------------------- Parameters --------------------------------
def init_params(key, input_size, hidden_size, num_layers, class_num):
    """Deterministic init matching PyTorch parameter shapes (uniform(-k, k))."""
    params = {"layers": []}
    for layer in range(num_layers):
        d_in = input_size if layer == 0 else hidden_size
        k = 1.0 / jnp.sqrt(hidden_size)
        key, k1, k2, k3, k4 = jax.random.split(key, 5)
        w_ih = jax.random.uniform(k1, (4 * hidden_size, d_in), jnp.float32, -k, k)
        w_hh = jax.random.uniform(k2, (4 * hidden_size, hidden_size), jnp.float32, -k, k)
        b_ih = jax.random.uniform(k3, (4 * hidden_size,), jnp.float32, -k, k)
        b_hh = jax.random.uniform(k4, (4 * hidden_size,), jnp.float32, -k, k)
        params["layers"].append(
            {"w_ih_t": w_ih.T, "w_hh_t": w_hh.T,
             "bias": (b_ih + b_hh).reshape(1, 4 * hidden_size)})
    k = 1.0 / jnp.sqrt(hidden_size)
    key, k1, k2 = jax.random.split(key, 3)
    w_out = jax.random.uniform(k1, (class_num, hidden_size), jnp.float32, -k, k)
    b_out = jax.random.uniform(k2, (class_num,), jnp.float32, -k, k)
    params["w_out_t"] = w_out.T
    params["b_out"] = b_out.reshape(1, class_num)
    return params


# ----------------------------------- Forward ----------------------------------
@functools.partial(jax.jit, static_argnames=("time_step", "input_size",
                                              "hidden_size", "class_num",
                                              "num_layers"))
def lstm_forward(slab, x, *, time_step, input_size, hidden_size, class_num,
                 num_layers):
    # x.view(-1, TIME_STEP, INPUT_SIZE)
    x = x.reshape(-1, time_step, input_size)                  # (B, T, D)
    B = x.shape[0]
    # Time-major row order (t, b): per-step slices of the hoisted layer-0
    # projection become contiguous sublane slices inside the kernel.
    x2d = jnp.transpose(x, (1, 0, 2)).reshape(time_step * B, input_size)
    return _fused_forward(x2d, slab, B=B, T=time_step, D=input_size,
                          H=hidden_size, C=class_num, num_layers=num_layers)


# ---------------------------- Pure-JAX reference -------------------------------
def reference_forward(params, x, *, time_step, input_size):
    x = x.reshape(-1, time_step, input_size)
    h_seq = jnp.transpose(x, (1, 0, 2))               # (T, B, D)
    for lp in params["layers"]:
        H = lp["w_hh_t"].shape[0]
        B = h_seq.shape[1]

        def step(carry, x_t, lp=lp, H=H):
            h, c = carry
            gates = x_t @ lp["w_ih_t"] + h @ lp["w_hh_t"] + lp["bias"]
            i = jax.nn.sigmoid(gates[:, :H])
            f = jax.nn.sigmoid(gates[:, H:2 * H])
            g = jnp.tanh(gates[:, 2 * H:3 * H])
            o = jax.nn.sigmoid(gates[:, 3 * H:4 * H])
            c = f * c + i * g
            h = o * jnp.tanh(c)
            return (h, c), h

        init = (jnp.zeros((B, H), jnp.float32), jnp.zeros((B, H), jnp.float32))
        _, h_seq = jax.lax.scan(step, init, h_seq)
    return h_seq[-1] @ params["w_out_t"] + params["b_out"]


# ------------------------------------- Main ------------------------------------
if __name__ == "__main__":
    INPUT_SIZE = 8
    TIME_STEP = 8
    CLASS_NUM = 4
    HIDDEN_SIZE = 32
    NUM_LAYERS = 2
    BATCH = 2

    key = jax.random.PRNGKey(0)
    kp, kx = jax.random.split(key)
    params = init_params(kp, INPUT_SIZE, HIDDEN_SIZE, NUM_LAYERS, CLASS_NUM)
    # One-time weight packing (outside jit): single VMEM slab for the kernel.
    slab = jax.block_until_ready(pack_params(params))

    x = jax.random.normal(kx, (BATCH, TIME_STEP, INPUT_SIZE), jnp.float32)

    out = lstm_forward(slab, x, time_step=TIME_STEP, input_size=INPUT_SIZE,
                       hidden_size=HIDDEN_SIZE, class_num=CLASS_NUM,
                       num_layers=NUM_LAYERS)
    out = jax.block_until_ready(out)

    ref = reference_forward(params, x, time_step=TIME_STEP, input_size=INPUT_SIZE)
    assert out.shape == (BATCH, CLASS_NUM), out.shape
    assert jnp.allclose(out, ref, atol=1e-4, rtol=1e-4), (out, ref)

    print("KERNEL_OK")
</pallas_src>

<mosaic_0001>
module attributes {stable_mosaic.version = 11 : i64} {
  func.func @kernel(%arg0: memref<16x8xf32, #tpu.memory_space<vmem>>, %arg1: memref<160x128xf32, #tpu.memory_space<vmem>>, %arg2: memref<2x4xf32, #tpu.memory_space<vmem>>) attributes {dimension_semantics = [], scalar_prefetch = 0 : i64, scratch_operands = 0 : i64, tpu.core_type = #tpu.core_type<tc>} {
    %0 = tpu.iota {dimensions = array<i32: 1>} : vector<2x128xi32>
    %c64_i32 = arith.constant 64 : i32
    %1 = vector.broadcast %c64_i32 : i32 to vector<2x128xi32>
    %2 = arith.cmpi sge, %0, %1 : vector<2x128xi32>
    %c96_i32 = arith.constant 96 : i32
    %3 = vector.broadcast %c96_i32 : i32 to vector<2x128xi32>
    %4 = arith.cmpi slt, %0, %3 : vector<2x128xi32>
    %5 = arith.andi %2, %4 : vector<2x128xi1>
    %c0 = arith.constant 0 : index
    %c0_0 = arith.constant 0 : index
    %6 = vector.load %arg1[%c0, %c0_0] : memref<160x128xf32, #tpu.memory_space<vmem>>, vector<8x128xf32>
    %c8 = arith.constant 8 : index
    %c0_1 = arith.constant 0 : index
    %7 = vector.load %arg1[%c8, %c0_1] : memref<160x128xf32, #tpu.memory_space<vmem>>, vector<32x128xf32>
    %c40 = arith.constant 40 : index
    %c0_2 = arith.constant 0 : index
    %8 = vector.load %arg1[%c40, %c0_2] : memref<160x128xf32, #tpu.memory_space<vmem>>, vector<1x128xf32>
    %c48 = arith.constant 48 : index
    %c0_3 = arith.constant 0 : index
    %9 = vector.load %arg1[%c48, %c0_3] : memref<160x128xf32, #tpu.memory_space<vmem>>, vector<64x128xf32>
    %c112 = arith.constant 112 : index
    %c0_4 = arith.constant 0 : index
    %10 = vector.load %arg1[%c112, %c0_4] : memref<160x128xf32, #tpu.memory_space<vmem>>, vector<1x128xf32>
    %11 = vector.shape_cast %10 : vector<1x128xf32> to vector<1x128xf32>
    %12 = vector.broadcast %11 : vector<1x128xf32> to vector<2x128xf32>
    %c120 = arith.constant 120 : index
    %c0_5 = arith.constant 0 : index
    %13 = vector.load %arg1[%c120, %c0_5] : memref<160x128xf32, #tpu.memory_space<vmem>>, vector<32x128xf32>
    %c152 = arith.constant 152 : index
    %c0_6 = arith.constant 0 : index
    %14 = vector.load %arg1[%c152, %c0_6] : memref<160x128xf32, #tpu.memory_space<vmem>>, vector<1x128xf32>
    %c0_7 = arith.constant 0 : index
    %c0_8 = arith.constant 0 : index
    %15 = vector.load %arg0[%c0_7, %c0_8] : memref<16x8xf32, #tpu.memory_space<vmem>>, vector<16x8xf32>
    %cst = arith.constant dense<0.000000e+00> : vector<16x128xf32>
    %16 = tpu.matmul %15, %6, %cst {dimension_numbers = #tpu.dot_dimension_numbers<[1], [0], [0], [1], [0, 0, 1, 1], [], []>} : vector<16x8xf32>, vector<8x128xf32>, vector<16x128xf32> -> vector<16x128xf32>
    %17 = vector.broadcast %8 : vector<1x128xf32> to vector<16x128xf32>
    %18 = arith.addf %16, %17 : vector<16x128xf32>
    %cst_9 = arith.constant 0.000000e+00 : f32
    %19 = vector.broadcast %cst_9 : f32 to vector<2x32xf32>
    %cst_10 = arith.constant 0.000000e+00 : f32
    %20 = vector.broadcast %cst_10 : f32 to vector<2x32xf32>
    %cst_11 = arith.constant 0.000000e+00 : f32
    %21 = vector.broadcast %cst_11 : f32 to vector<2x32xf32>
    %cst_12 = arith.constant 0.000000e+00 : f32
    %22 = vector.broadcast %cst_12 : f32 to vector<2x32xf32>
    %23 = vector.extract_strided_slice %18 {offsets = [0, 0], sizes = [2, 128], strides = [1, 1]} : vector<16x128xf32> to vector<2x128xf32>
    %cst_13 = arith.constant dense<0.000000e+00> : vector<2x128xf32>
    %24 = tpu.matmul %19, %7, %cst_13 {dimension_numbers = #tpu.dot_dimension_numbers<[1], [0], [0], [1], [0, 0, 1, 1], [], []>} : vector<2x32xf32>, vector<32x128xf32>, vector<2x128xf32> -> vector<2x128xf32>
    %25 = arith.addf %23, %24 : vector<2x128xf32>
    %26 = arith.negf %25 : vector<2x128xf32>
    %27 = math.exp %26 : vector<2x128xf32>
    %cst_14 = arith.constant 1.000000e+00 : f32
    %28 = vector.broadcast %cst_14 : f32 to vector<2x128xf32>
    %29 = arith.addf %28, %27 : vector<2x128xf32>
    %30 = arith.divf %28, %29 : vector<2x128xf32>
    %cst_15 = arith.constant 2.000000e+00 : f32
    %31 = vector.broadcast %cst_15 : f32 to vector<2x128xf32>
    %32 = arith.mulf %31, %30 : vector<2x128xf32>
    %cst_16 = arith.constant 1.000000e+00 : f32
    %33 = vector.broadcast %cst_16 : f32 to vector<2x128xf32>
    %34 = arith.subf %32, %33 : vector<2x128xf32>
    %35 = arith.select %5, %34, %30 : vector<2x128xi1>, vector<2x128xf32>
    %36 = vector.extract_strided_slice %35 {offsets = [0, 0], sizes = [2, 32], strides = [1, 1]} : vector<2x128xf32> to vector<2x32xf32>
    %37 = vector.extract_strided_slice %35 {offsets = [0, 32], sizes = [2, 32], strides = [1, 1]} : vector<2x128xf32> to vector<2x32xf32>
    %38 = vector.extract_strided_slice %35 {offsets = [0, 64], sizes = [2, 32], strides = [1, 1]} : vector<2x128xf32> to vector<2x32xf32>
    %39 = vector.extract_strided_slice %35 {offsets = [0, 96], sizes = [2, 32], strides = [1, 1]} : vector<2x128xf32> to vector<2x32xf32>
    %40 = arith.mulf %37, %21 : vector<2x32xf32>
    %41 = arith.mulf %36, %38 : vector<2x32xf32>
    %42 = arith.addf %40, %41 : vector<2x32xf32>
    %43 = math.tanh %42 : vector<2x32xf32>
    %44 = arith.mulf %39, %43 : vector<2x32xf32>
    %45 = tpu.concatenate %44, %20 in 1 : vector<2x32xf32>, vector<2x32xf32> -> vector<2x64xf32>
    %cst_17 = arith.constant dense<0.000000e+00> : vector<2x128xf32>
    %46 = tpu.matmul %45, %9, %cst_17 {dimension_numbers = #tpu.dot_dimension_numbers<[1], [0], [0], [1], [0, 0, 1, 1], [], []>} : vector<2x64xf32>, vector<64x128xf32>, vector<2x128xf32> -> vector<2x128xf32>
    %47 = arith.addf %46, %12 : vector<2x128xf32>
    %48 = arith.negf %47 : vector<2x128xf32>
    %49 = math.exp %48 : vector<2x128xf32>
    %cst_18 = arith.constant 1.000000e+00 : f32
    %50 = vector.broadcast %cst_18 : f32 to vector<2x128xf32>
    %51 = arith.addf %50, %49 : vector<2x128xf32>
    %52 = arith.divf %50, %51 : vector<2x128xf32>
    %cst_19 = arith.constant 2.000000e+00 : f32
    %53 = vector.broadcast %cst_19 : f32 to vector<2x128xf32>
    %54 = arith.mulf %53, %52 : vector<2x128xf32>
    %cst_20 = arith.constant 1.000000e+00 : f32
    %55 = vector.broadcast %cst_20 : f32 to vector<2x128xf32>
    %56 = arith.subf %54, %55 : vector<2x128xf32>
    %57 = arith.select %5, %56, %52 : vector<2x128xi1>, vector<2x128xf32>
    %58 = vector.extract_strided_slice %57 {offsets = [0, 0], sizes = [2, 32], strides = [1, 1]} : vector<2x128xf32> to vector<2x32xf32>
    %59 = vector.extract_strided_slice %57 {offsets = [0, 32], sizes = [2, 32], strides = [1, 1]} : vector<2x128xf32> to vector<2x32xf32>
    %60 = vector.extract_strided_slice %57 {offsets = [0, 64], sizes = [2, 32], strides = [1, 1]} : vector<2x128xf32> to vector<2x32xf32>
    %61 = vector.extract_strided_slice %57 {offsets = [0, 96], sizes = [2, 32], strides = [1, 1]} : vector<2x128xf32> to vector<2x32xf32>
    %62 = arith.mulf %59, %22 : vector<2x32xf32>
    %63 = arith.mulf %58, %60 : vector<2x32xf32>
    %64 = arith.addf %62, %63 : vector<2x32xf32>
    %65 = math.tanh %64 : vector<2x32xf32>
    %66 = arith.mulf %61, %65 : vector<2x32xf32>
    %67 = vector.extract_strided_slice %18 {offsets = [2, 0], sizes = [2, 128], strides = [1, 1]} : vector<16x128xf32> to vector<2x128xf32>
    %cst_21 = arith.constant dense<0.000000e+00> : vector<2x128xf32>
    %68 = tpu.matmul %44, %7, %cst_21 {dimension_numbers = #tpu.dot_dimension_numbers<[1], [0], [0], [1], [0, 0, 1, 1], [], []>} : vector<2x32xf32>, vector<32x128xf32>, vector<2x128xf32> -> vector<2x128xf32>
    %69 = arith.addf %67, %68 : vector<2x128xf32>
    %70 = arith.negf %69 : vector<2x128xf32>
    %71 = math.exp %70 : vector<2x128xf32>
    %cst_22 = arith.constant 1.000000e+00 : f32
    %72 = vector.broadcast %cst_22 : f32 to vector<2x128xf32>
    %73 = arith.addf %72, %71 : vector<2x128xf32>
    %74 = arith.divf %72, %73 : vector<2x128xf32>
    %cst_23 = arith.constant 2.000000e+00 : f32
    %75 = vector.broadcast %cst_23 : f32 to vector<2x128xf32>
    %76 = arith.mulf %75, %74 : vector<2x128xf32>
    %cst_24 = arith.constant 1.000000e+00 : f32
    %77 = vector.broadcast %cst_24 : f32 to vector<2x128xf32>
    %78 = arith.subf %76, %77 : vector<2x128xf32>
    %79 = arith.select %5, %78, %74 : vector<2x128xi1>, vector<2x128xf32>
    %80 = vector.extract_strided_slice %79 {offsets = [0, 0], sizes = [2, 32], strides = [1, 1]} : vector<2x128xf32> to vector<2x32xf32>
    %81 = vector.extract_strided_slice %79 {offsets = [0, 32], sizes = [2, 32], strides = [1, 1]} : vector<2x128xf32> to vector<2x32xf32>
    %82 = vector.extract_strided_slice %79 {offsets = [0, 64], sizes = [2, 32], strides = [1, 1]} : vector<2x128xf32> to vector<2x32xf32>
    %83 = vector.extract_strided_slice %79 {offsets = [0, 96], sizes = [2, 32], strides = [1, 1]} : vector<2x128xf32> to vector<2x32xf32>
    %84 = arith.mulf %81, %42 : vector<2x32xf32>
    %85 = arith.mulf %80, %82 : vector<2x32xf32>
    %86 = arith.addf %84, %85 : vector<2x32xf32>
    %87 = math.tanh %86 : vector<2x32xf32>
    %88 = arith.mulf %83, %87 : vector<2x32xf32>
    %89 = tpu.concatenate %88, %66 in 1 : vector<2x32xf32>, vector<2x32xf32> -> vector<2x64xf32>
    %cst_25 = arith.constant dense<0.000000e+00> : vector<2x128xf32>
    %90 = tpu.matmul %89, %9, %cst_25 {dimension_numbers = #tpu.dot_dimension_numbers<[1], [0], [0], [1], [0, 0, 1, 1], [], []>} : vector<2x64xf32>, vector<64x128xf32>, vector<2x128xf32> -> vector<2x128xf32>
    %91 = arith.addf %90, %12 : vector<2x128xf32>
    %92 = arith.negf %91 : vector<2x128xf32>
    %93 = math.exp %92 : vector<2x128xf32>
    %cst_26 = arith.constant 1.000000e+00 : f32
    %94 = vector.broadcast %cst_26 : f32 to vector<2x128xf32>
    %95 = arith.addf %94, %93 : vector<2x128xf32>
    %96 = arith.divf %94, %95 : vector<2x128xf32>
    %cst_27 = arith.constant 2.000000e+00 : f32
    %97 = vector.broadcast %cst_27 : f32 to vector<2x128xf32>
    %98 = arith.mulf %97, %96 : vector<2x128xf32>
    %cst_28 = arith.constant 1.000000e+00 : f32
    %99 = vector.broadcast %cst_28 : f32 to vector<2x128xf32>
    %100 = arith.subf %98, %99 : vector<2x128xf32>
    %101 = arith.select %5, %100, %96 : vector<2x128xi1>, vector<2x128xf32>
    %102 = vector.extract_strided_slice %101 {offsets = [0, 0], sizes = [2, 32], strides = [1, 1]} : vector<2x128xf32> to vector<2x32xf32>
    %103 = vector.extract_strided_slice %101 {offsets = [0, 32], sizes = [2, 32], strides = [1, 1]} : vector<2x128xf32> to vector<2x32xf32>
    %104 = vector.extract_strided_slice %101 {offsets = [0, 64], sizes = [2, 32], strides = [1, 1]} : vector<2x128xf32> to vector<2x32xf32>
    %105 = vector.extract_strided_slice %101 {offsets = [0, 96], sizes = [2, 32], strides = [1, 1]} : vector<2x128xf32> to vector<2x32xf32>
    %106 = arith.mulf %103, %64 : vector<2x32xf32>
    %107 = arith.mulf %102, %104 : vector<2x32xf32>
    %108 = arith.addf %106, %107 : vector<2x32xf32>
    %109 = math.tanh %108 : vector<2x32xf32>
    %110 = arith.mulf %105, %109 : vector<2x32xf32>
    %111 = vector.extract_strided_slice %18 {offsets = [4, 0], sizes = [2, 128], strides = [1, 1]} : vector<16x128xf32> to vector<2x128xf32>
    %cst_29 = arith.constant dense<0.000000e+00> : vector<2x128xf32>
    %112 = tpu.matmul %88, %7, %cst_29 {dimension_numbers = #tpu.dot_dimension_numbers<[1], [0], [0], [1], [0, 0, 1, 1], [], []>} : vector<2x32xf32>, vector<32x128xf32>, vector<2x128xf32> -> vector<2x128xf32>
    %113 = arith.addf %111, %112 : vector<2x128xf32>
    %114 = arith.negf %113 : vector<2x128xf32>
    %115 = math.exp %114 : vector<2x128xf32>
    %cst_30 = arith.constant 1.000000e+00 : f32
    %116 = vector.broadcast %cst_30 : f32 to vector<2x128xf32>
    %117 = arith.addf %116, %115 : vector<2x128xf32>
    %118 = arith.divf %116, %117 : vector<2x128xf32>
    %cst_31 = arith.constant 2.000000e+00 : f32
    %119 = vector.broadcast %cst_31 : f32 to vector<2x128xf32>
    %120 = arith.mulf %119, %118 : vector<2x128xf32>
    %cst_32 = arith.constant 1.000000e+00 : f32
    %121 = vector.broadcast %cst_32 : f32 to vector<2x128xf32>
    %122 = arith.subf %120, %121 : vector<2x128xf32>
    %123 = arith.select %5, %122, %118 : vector<2x128xi1>, vector<2x128xf32>
    %124 = vector.extract_strided_slice %123 {offsets = [0, 0], sizes = [2, 32], strides = [1, 1]} : vector<2x128xf32> to vector<2x32xf32>
    %125 = vector.extract_strided_slice %123 {offsets = [0, 32], sizes = [2, 32], strides = [1, 1]} : vector<2x128xf32> to vector<2x32xf32>
    %126 = vector.extract_strided_slice %123 {offsets = [0, 64], sizes = [2, 32], strides = [1, 1]} : vector<2x128xf32> to vector<2x32xf32>
    %127 = vector.extract_strided_slice %123 {offsets = [0, 96], sizes = [2, 32], strides = [1, 1]} : vector<2x128xf32> to vector<2x32xf32>
    %128 = arith.mulf %125, %86 : vector<2x32xf32>
    %129 = arith.mulf %124, %126 : vector<2x32xf32>
    %130 = arith.addf %128, %129 : vector<2x32xf32>
    %131 = math.tanh %130 : vector<2x32xf32>
    %132 = arith.mulf %127, %131 : vector<2x32xf32>
    %133 = tpu.concatenate %132, %110 in 1 : vector<2x32xf32>, vector<2x32xf32> -> vector<2x64xf32>
    %cst_33 = arith.constant dense<0.000000e+00> : vector<2x128xf32>
    %134 = tpu.matmul %133, %9, %cst_33 {dimension_numbers = #tpu.dot_dimension_numbers<[1], [0], [0], [1], [0, 0, 1, 1], [], []>} : vector<2x64xf32>, vector<64x128xf32>, vector<2x128xf32> -> vector<2x128xf32>
    %135 = arith.addf %134, %12 : vector<2x128xf32>
    %136 = arith.negf %135 : vector<2x128xf32>
    %137 = math.exp %136 : vector<2x128xf32>
    %cst_34 = arith.constant 1.000000e+00 : f32
    %138 = vector.broadcast %cst_34 : f32 to vector<2x128xf32>
    %139 = arith.addf %138, %137 : vector<2x128xf32>
    %140 = arith.divf %138, %139 : vector<2x128xf32>
    %cst_35 = arith.constant 2.000000e+00 : f32
    %141 = vector.broadcast %cst_35 : f32 to vector<2x128xf32>
    %142 = arith.mulf %141, %140 : vector<2x128xf32>
    %cst_36 = arith.constant 1.000000e+00 : f32
    %143 = vector.broadcast %cst_36 : f32 to vector<2x128xf32>
    %144 = arith.subf %142, %143 : vector<2x128xf32>
    %145 = arith.select %5, %144, %140 : vector<2x128xi1>, vector<2x128xf32>
    %146 = vector.extract_strided_slice %145 {offsets = [0, 0], sizes = [2, 32], strides = [1, 1]} : vector<2x128xf32> to vector<2x32xf32>
    %147 = vector.extract_strided_slice %145 {offsets = [0, 32], sizes = [2, 32], strides = [1, 1]} : vector<2x128xf32> to vector<2x32xf32>
    %148 = vector.extract_strided_slice %145 {offsets = [0, 64], sizes = [2, 32], strides = [1, 1]} : vector<2x128xf32> to vector<2x32xf32>
    %149 = vector.extract_strided_slice %145 {offsets = [0, 96], sizes = [2, 32], strides = [1, 1]} : vector<2x128xf32> to vector<2x32xf32>
    %150 = arith.mulf %147, %108 : vector<2x32xf32>
    %151 = arith.mulf %146, %148 : vector<2x32xf32>
    %152 = arith.addf %150, %151 : vector<2x32xf32>
    %153 = math.tanh %152 : vector<2x32xf32>
    %154 = arith.mulf %149, %153 : vector<2x32xf32>
    %155 = vector.extract_strided_slice %18 {offsets = [6, 0], sizes = [2, 128], strides = [1, 1]} : vector<16x128xf32> to vector<2x128xf32>
    %cst_37 = arith.constant dense<0.000000e+00> : vector<2x128xf32>
    %156 = tpu.matmul %132, %7, %cst_37 {dimension_numbers = #tpu.dot_dimension_numbers<[1], [0], [0], [1], [0, 0, 1, 1], [], []>} : vector<2x32xf32>, vector<32x128xf32>, vector<2x128xf32> -> vector<2x128xf32>
    %157 = arith.addf %155, %156 : vector<2x128xf32>
    %158 = arith.negf %157 : vector<2x128xf32>
    %159 = math.exp %158 : vector<2x128xf32>
    %cst_38 = arith.constant 1.000000e+00 : f32
    %160 = vector.broadcast %cst_38 : f32 to vector<2x128xf32>
    %161 = arith.addf %160, %159 : vector<2x128xf32>
    %162 = arith.divf %160, %161 : vector<2x128xf32>
    %cst_39 = arith.constant 2.000000e+00 : f32
    %163 = vector.broadcast %cst_39 : f32 to vector<2x128xf32>
    %164 = arith.mulf %163, %162 : vector<2x128xf32>
    %cst_40 = arith.constant 1.000000e+00 : f32
    %165 = vector.broadcast %cst_40 : f32 to vector<2x128xf32>
    %166 = arith.subf %164, %165 : vector<2x128xf32>
    %167 = arith.select %5, %166, %162 : vector<2x128xi1>, vector<2x128xf32>
    %168 = vector.extract_strided_slice %167 {offsets = [0, 0], sizes = [2, 32], strides = [1, 1]} : vector<2x128xf32> to vector<2x32xf32>
    %169 = vector.extract_strided_slice %167 {offsets = [0, 32], sizes = [2, 32], strides = [1, 1]} : vector<2x128xf32> to vector<2x32xf32>
    %170 = vector.extract_strided_slice %167 {offsets = [0, 64], sizes = [2, 32], strides = [1, 1]} : vector<2x128xf32> to vector<2x32xf32>
    %171 = vector.extract_strided_slice %167 {offsets = [0, 96], sizes = [2, 32], strides = [1, 1]} : vector<2x128xf32> to vector<2x32xf32>
    %172 = arith.mulf %169, %130 : vector<2x32xf32>
    %173 = arith.mulf %168, %170 : vector<2x32xf32>
    %174 = arith.addf %172, %173 : vector<2x32xf32>
    %175 = math.tanh %174 : vector<2x32xf32>
    %176 = arith.mulf %171, %175 : vector<2x32xf32>
    %177 = tpu.concatenate %176, %154 in 1 : vector<2x32xf32>, vector<2x32xf32> -> vector<2x64xf32>
    %cst_41 = arith.constant dense<0.000000e+00> : vector<2x128xf32>
    %178 = tpu.matmul %177, %9, %cst_41 {dimension_numbers = #tpu.dot_dimension_numbers<[1], [0], [0], [1], [0, 0, 1, 1], [], []>} : vector<2x64xf32>, vector<64x128xf32>, vector<2x128xf32> -> vector<2x128xf32>
    %179 = arith.addf %178, %12 : vector<2x128xf32>
    %180 = arith.negf %179 : vector<2x128xf32>
    %181 = math.exp %180 : vector<2x128xf32>
    %cst_42 = arith.constant 1.000000e+00 : f32
    %182 = vector.broadcast %cst_42 : f32 to vector<2x128xf32>
    %183 = arith.addf %182, %181 : vector<2x128xf32>
    %184 = arith.divf %182, %183 : vector<2x128xf32>
    %cst_43 = arith.constant 2.000000e+00 : f32
    %185 = vector.broadcast %cst_43 : f32 to vector<2x128xf32>
    %186 = arith.mulf %185, %184 : vector<2x128xf32>
    %cst_44 = arith.constant 1.000000e+00 : f32
    %187 = vector.broadcast %cst_44 : f32 to vector<2x128xf32>
    %188 = arith.subf %186, %187 : vector<2x128xf32>
    %189 = arith.select %5, %188, %184 : vector<2x128xi1>, vector<2x128xf32>
    %190 = vector.extract_strided_slice %189 {offsets = [0, 0], sizes = [2, 32], strides = [1, 1]} : vector<2x128xf32> to vector<2x32xf32>
    %191 = vector.extract_strided_slice %189 {offsets = [0, 32], sizes = [2, 32], strides = [1, 1]} : vector<2x128xf32> to vector<2x32xf32>
    %192 = vector.extract_strided_slice %189 {offsets = [0, 64], sizes = [2, 32], strides = [1, 1]} : vector<2x128xf32> to vector<2x32xf32>
    %193 = vector.extract_strided_slice %189 {offsets = [0, 96], sizes = [2, 32], strides = [1, 1]} : vector<2x128xf32> to vector<2x32xf32>
    %194 = arith.mulf %191, %152 : vector<2x32xf32>
    %195 = arith.mulf %190, %192 : vector<2x32xf32>
    %196 = arith.addf %194, %195 : vector<2x32xf32>
    %197 = math.tanh %196 : vector<2x32xf32>
    %198 = arith.mulf %193, %197 : vector<2x32xf32>
    %199 = vector.extract_strided_slice %18 {offsets = [8, 0], sizes = [2, 128], strides = [1, 1]} : vector<16x128xf32> to vector<2x128xf32>
    %cst_45 = arith.constant dense<0.000000e+00> : vector<2x128xf32>
    %200 = tpu.matmul %176, %7, %cst_45 {dimension_numbers = #tpu.dot_dimension_numbers<[1], [0], [0], [1], [0, 0, 1, 1], [], []>} : vector<2x32xf32>, vector<32x128xf32>, vector<2x128xf32> -> vector<2x128xf32>
    %201 = arith.addf %199, %200 : vector<2x128xf32>
    %202 = arith.negf %201 : vector<2x128xf32>
    %203 = math.exp %202 : vector<2x128xf32>
    %cst_46 = arith.constant 1.000000e+00 : f32
    %204 = vector.broadcast %cst_46 : f32 to vector<2x128xf32>
    %205 = arith.addf %204, %203 : vector<2x128xf32>
    %206 = arith.divf %204, %205 : vector<2x128xf32>
    %cst_47 = arith.constant 2.000000e+00 : f32
    %207 = vector.broadcast %cst_47 : f32 to vector<2x128xf32>
    %208 = arith.mulf %207, %206 : vector<2x128xf32>
    %cst_48 = arith.constant 1.000000e+00 : f32
    %209 = vector.broadcast %cst_48 : f32 to vector<2x128xf32>
    %210 = arith.subf %208, %209 : vector<2x128xf32>
    %211 = arith.select %5, %210, %206 : vector<2x128xi1>, vector<2x128xf32>
    %212 = vector.extract_strided_slice %211 {offsets = [0, 0], sizes = [2, 32], strides = [1, 1]} : vector<2x128xf32> to vector<2x32xf32>
    %213 = vector.extract_strided_slice %211 {offsets = [0, 32], sizes = [2, 32], strides = [1, 1]} : vector<2x128xf32> to vector<2x32xf32>
    %214 = vector.extract_strided_slice %211 {offsets = [0, 64], sizes = [2, 32], strides = [1, 1]} : vector<2x128xf32> to vector<2x32xf32>
    %215 = vector.extract_strided_slice %211 {offsets = [0, 96], sizes = [2, 32], strides = [1, 1]} : vector<2x128xf32> to vector<2x32xf32>
    %216 = arith.mulf %213, %174 : vector<2x32xf32>
    %217 = arith.mulf %212, %214 : vector<2x32xf32>
    %218 = arith.addf %216, %217 : vector<2x32xf32>
    %219 = math.tanh %218 : vector<2x32xf32>
    %220 = arith.mulf %215, %219 : vector<2x32xf32>
    %221 = tpu.concatenate %220, %198 in 1 : vector<2x32xf32>, vector<2x32xf32> -> vector<2x64xf32>
    %cst_49 = arith.constant dense<0.000000e+00> : vector<2x128xf32>
    %222 = tpu.matmul %221, %9, %cst_49 {dimension_numbers = #tpu.dot_dimension_numbers<[1], [0], [0], [1], [0, 0, 1, 1], [], []>} : vector<2x64xf32>, vector<64x128xf32>, vector<2x128xf32> -> vector<2x128xf32>
    %223 = arith.addf %222, %12 : vector<2x128xf32>
    %224 = arith.negf %223 : vector<2x128xf32>
    %225 = math.exp %224 : vector<2x128xf32>
    %cst_50 = arith.constant 1.000000e+00 : f32
    %226 = vector.broadcast %cst_50 : f32 to vector<2x128xf32>
    %227 = arith.addf %226, %225 : vector<2x128xf32>
    %228 = arith.divf %226, %227 : vector<2x128xf32>
    %cst_51 = arith.constant 2.000000e+00 : f32
    %229 = vector.broadcast %cst_51 : f32 to vector<2x128xf32>
    %230 = arith.mulf %229, %228 : vector<2x128xf32>
    %cst_52 = arith.constant 1.000000e+00 : f32
    %231 = vector.broadcast %cst_52 : f32 to vector<2x128xf32>
    %232 = arith.subf %230, %231 : vector<2x128xf32>
    %233 = arith.select %5, %232, %228 : vector<2x128xi1>, vector<2x128xf32>
    %234 = vector.extract_strided_slice %233 {offsets = [0, 0], sizes = [2, 32], strides = [1, 1]} : vector<2x128xf32> to vector<2x32xf32>
    %235 = vector.extract_strided_slice %233 {offsets = [0, 32], sizes = [2, 32], strides = [1, 1]} : vector<2x128xf32> to vector<2x32xf32>
    %236 = vector.extract_strided_slice %233 {offsets = [0, 64], sizes = [2, 32], strides = [1, 1]} : vector<2x128xf32> to vector<2x32xf32>
    %237 = vector.extract_strided_slice %233 {offsets = [0, 96], sizes = [2, 32], strides = [1, 1]} : vector<2x128xf32> to vector<2x32xf32>
    %238 = arith.mulf %235, %196 : vector<2x32xf32>
    %239 = arith.mulf %234, %236 : vector<2x32xf32>
    %240 = arith.addf %238, %239 : vector<2x32xf32>
    %241 = math.tanh %240 : vector<2x32xf32>
    %242 = arith.mulf %237, %241 : vector<2x32xf32>
    %243 = vector.extract_strided_slice %18 {offsets = [10, 0], sizes = [2, 128], strides = [1, 1]} : vector<16x128xf32> to vector<2x128xf32>
    %cst_53 = arith.constant dense<0.000000e+00> : vector<2x128xf32>
    %244 = tpu.matmul %220, %7, %cst_53 {dimension_numbers = #tpu.dot_dimension_numbers<[1], [0], [0], [1], [0, 0, 1, 1], [], []>} : vector<2x32xf32>, vector<32x128xf32>, vector<2x128xf32> -> vector<2x128xf32>
    %245 = arith.addf %243, %244 : vector<2x128xf32>
    %246 = arith.negf %245 : vector<2x128xf32>
    %247 = math.exp %246 : vector<2x128xf32>
    %cst_54 = arith.constant 1.000000e+00 : f32
    %248 = vector.broadcast %cst_54 : f32 to vector<2x128xf32>
    %249 = arith.addf %248, %247 : vector<2x128xf32>
    %250 = arith.divf %248, %249 : vector<2x128xf32>
    %cst_55 = arith.constant 2.000000e+00 : f32
    %251 = vector.broadcast %cst_55 : f32 to vector<2x128xf32>
    %252 = arith.mulf %251, %250 : vector<2x128xf32>
    %cst_56 = arith.constant 1.000000e+00 : f32
    %253 = vector.broadcast %cst_56 : f32 to vector<2x128xf32>
    %254 = arith.subf %252, %253 : vector<2x128xf32>
    %255 = arith.select %5, %254, %250 : vector<2x128xi1>, vector<2x128xf32>
    %256 = vector.extract_strided_slice %255 {offsets = [0, 0], sizes = [2, 32], strides = [1, 1]} : vector<2x128xf32> to vector<2x32xf32>
    %257 = vector.extract_strided_slice %255 {offsets = [0, 32], sizes = [2, 32], strides = [1, 1]} : vector<2x128xf32> to vector<2x32xf32>
    %258 = vector.extract_strided_slice %255 {offsets = [0, 64], sizes = [2, 32], strides = [1, 1]} : vector<2x128xf32> to vector<2x32xf32>
    %259 = vector.extract_strided_slice %255 {offsets = [0, 96], sizes = [2, 32], strides = [1, 1]} : vector<2x128xf32> to vector<2x32xf32>
    %260 = arith.mulf %257, %218 : vector<2x32xf32>
    %261 = arith.mulf %256, %258 : vector<2x32xf32>
    %262 = arith.addf %260, %261 : vector<2x32xf32>
    %263 = math.tanh %262 : vector<2x32xf32>
    %264 = arith.mulf %259, %263 : vector<2x32xf32>
    %265 = tpu.concatenate %264, %242 in 1 : vector<2x32xf32>, vector<2x32xf32> -> vector<2x64xf32>
    %cst_57 = arith.constant dense<0.000000e+00> : vector<2x128xf32>
    %266 = tpu.matmul %265, %9, %cst_57 {dimension_numbers = #tpu.dot_dimension_numbers<[1], [0], [0], [1], [0, 0, 1, 1], [], []>} : vector<2x64xf32>, vector<64x128xf32>, vector<2x128xf32> -> vector<2x128xf32>
    %267 = arith.addf %266, %12 : vector<2x128xf32>
    %268 = arith.negf %267 : vector<2x128xf32>
    %269 = math.exp %268 : vector<2x128xf32>
    %cst_58 = arith.constant 1.000000e+00 : f32
    %270 = vector.broadcast %cst_58 : f32 to vector<2x128xf32>
    %271 = arith.addf %270, %269 : vector<2x128xf32>
    %272 = arith.divf %270, %271 : vector<2x128xf32>
    %cst_59 = arith.constant 2.000000e+00 : f32
    %273 = vector.broadcast %cst_59 : f32 to vector<2x128xf32>
    %274 = arith.mulf %273, %272 : vector<2x128xf32>
    %cst_60 = arith.constant 1.000000e+00 : f32
    %275 = vector.broadcast %cst_60 : f32 to vector<2x128xf32>
    %276 = arith.subf %274, %275 : vector<2x128xf32>
    %277 = arith.select %5, %276, %272 : vector<2x128xi1>, vector<2x128xf32>
    %278 = vector.extract_strided_slice %277 {offsets = [0, 0], sizes = [2, 32], strides = [1, 1]} : vector<2x128xf32> to vector<2x32xf32>
    %279 = vector.extract_strided_slice %277 {offsets = [0, 32], sizes = [2, 32], strides = [1, 1]} : vector<2x128xf32> to vector<2x32xf32>
    %280 = vector.extract_strided_slice %277 {offsets = [0, 64], sizes = [2, 32], strides = [1, 1]} : vector<2x128xf32> to vector<2x32xf32>
    %281 = vector.extract_strided_slice %277 {offsets = [0, 96], sizes = [2, 32], strides = [1, 1]} : vector<2x128xf32> to vector<2x32xf32>
    %282 = arith.mulf %279, %240 : vector<2x32xf32>
    %283 = arith.mulf %278, %280 : vector<2x32xf32>
    %284 = arith.addf %282, %283 : vector<2x32xf32>
    %285 = math.tanh %284 : vector<2x32xf32>
    %286 = arith.mulf %281, %285 : vector<2x32xf32>
    %287 = vector.extract_strided_slice %18 {offsets = [12, 0], sizes = [2, 128], strides = [1, 1]} : vector<16x128xf32> to vector<2x128xf32>
    %cst_61 = arith.constant dense<0.000000e+00> : vector<2x128xf32>
    %288 = tpu.matmul %264, %7, %cst_61 {dimension_numbers = #tpu.dot_dimension_numbers<[1], [0], [0], [1], [0, 0, 1, 1], [], []>} : vector<2x32xf32>, vector<32x128xf32>, vector<2x128xf32> -> vector<2x128xf32>
    %289 = arith.addf %287, %288 : vector<2x128xf32>
    %290 = arith.negf %289 : vector<2x128xf32>
    %291 = math.exp %290 : vector<2x128xf32>
    %cst_62 = arith.constant 1.000000e+00 : f32
    %292 = vector.broadcast %cst_62 : f32 to vector<2x128xf32>
    %293 = arith.addf %292, %291 : vector<2x128xf32>
    %294 = arith.divf %292, %293 : vector<2x128xf32>
    %cst_63 = arith.constant 2.000000e+00 : f32
    %295 = vector.broadcast %cst_63 : f32 to vector<2x128xf32>
    %296 = arith.mulf %295, %294 : vector<2x128xf32>
    %cst_64 = arith.constant 1.000000e+00 : f32
    %297 = vector.broadcast %cst_64 : f32 to vector<2x128xf32>
    %298 = arith.subf %296, %297 : vector<2x128xf32>
    %299 = arith.select %5, %298, %294 : vector<2x128xi1>, vector<2x128xf32>
    %300 = vector.extract_strided_slice %299 {offsets = [0, 0], sizes = [2, 32], strides = [1, 1]} : vector<2x128xf32> to vector<2x32xf32>
    %301 = vector.extract_strided_slice %299 {offsets = [0, 32], sizes = [2, 32], strides = [1, 1]} : vector<2x128xf32> to vector<2x32xf32>
    %302 = vector.extract_strided_slice %299 {offsets = [0, 64], sizes = [2, 32], strides = [1, 1]} : vector<2x128xf32> to vector<2x32xf32>
    %303 = vector.extract_strided_slice %299 {offsets = [0, 96], sizes = [2, 32], strides = [1, 1]} : vector<2x128xf32> to vector<2x32xf32>
    %304 = arith.mulf %301, %262 : vector<2x32xf32>
    %305 = arith.mulf %300, %302 : vector<2x32xf32>
    %306 = arith.addf %304, %305 : vector<2x32xf32>
    %307 = math.tanh %306 : vector<2x32xf32>
    %308 = arith.mulf %303, %307 : vector<2x32xf32>
    %309 = tpu.concatenate %308, %286 in 1 : vector<2x32xf32>, vector<2x32xf32> -> vector<2x64xf32>
    %cst_65 = arith.constant dense<0.000000e+00> : vector<2x128xf32>
    %310 = tpu.matmul %309, %9, %cst_65 {dimension_numbers = #tpu.dot_dimension_numbers<[1], [0], [0], [1], [0, 0, 1, 1], [], []>} : vector<2x64xf32>, vector<64x128xf32>, vector<2x128xf32> -> vector<2x128xf32>
    %311 = arith.addf %310, %12 : vector<2x128xf32>
    %312 = arith.negf %311 : vector<2x128xf32>
    %313 = math.exp %312 : vector<2x128xf32>
    %cst_66 = arith.constant 1.000000e+00 : f32
    %314 = vector.broadcast %cst_66 : f32 to vector<2x128xf32>
    %315 = arith.addf %314, %313 : vector<2x128xf32>
    %316 = arith.divf %314, %315 : vector<2x128xf32>
    %cst_67 = arith.constant 2.000000e+00 : f32
    %317 = vector.broadcast %cst_67 : f32 to vector<2x128xf32>
    %318 = arith.mulf %317, %316 : vector<2x128xf32>
    %cst_68 = arith.constant 1.000000e+00 : f32
    %319 = vector.broadcast %cst_68 : f32 to vector<2x128xf32>
    %320 = arith.subf %318, %319 : vector<2x128xf32>
    %321 = arith.select %5, %320, %316 : vector<2x128xi1>, vector<2x128xf32>
    %322 = vector.extract_strided_slice %321 {offsets = [0, 0], sizes = [2, 32], strides = [1, 1]} : vector<2x128xf32> to vector<2x32xf32>
    %323 = vector.extract_strided_slice %321 {offsets = [0, 32], sizes = [2, 32], strides = [1, 1]} : vector<2x128xf32> to vector<2x32xf32>
    %324 = vector.extract_strided_slice %321 {offsets = [0, 64], sizes = [2, 32], strides = [1, 1]} : vector<2x128xf32> to vector<2x32xf32>
    %325 = vector.extract_strided_slice %321 {offsets = [0, 96], sizes = [2, 32], strides = [1, 1]} : vector<2x128xf32> to vector<2x32xf32>
    %326 = arith.mulf %323, %284 : vector<2x32xf32>
    %327 = arith.mulf %322, %324 : vector<2x32xf32>
    %328 = arith.addf %326, %327 : vector<2x32xf32>
    %329 = math.tanh %328 : vector<2x32xf32>
    %330 = arith.mulf %325, %329 : vector<2x32xf32>
    %331 = vector.extract_strided_slice %18 {offsets = [14, 0], sizes = [2, 128], strides = [1, 1]} : vector<16x128xf32> to vector<2x128xf32>
    %cst_69 = arith.constant dense<0.000000e+00> : vector<2x128xf32>
    %332 = tpu.matmul %308, %7, %cst_69 {dimension_numbers = #tpu.dot_dimension_numbers<[1], [0], [0], [1], [0, 0, 1, 1], [], []>} : vector<2x32xf32>, vector<32x128xf32>, vector<2x128xf32> -> vector<2x128xf32>
    %333 = arith.addf %331, %332 : vector<2x128xf32>
    %334 = arith.negf %333 : vector<2x128xf32>
    %335 = math.exp %334 : vector<2x128xf32>
    %cst_70 = arith.constant 1.000000e+00 : f32
    %336 = vector.broadcast %cst_70 : f32 to vector<2x128xf32>
    %337 = arith.addf %336, %335 : vector<2x128xf32>
    %338 = arith.divf %336, %337 : vector<2x128xf32>
    %cst_71 = arith.constant 2.000000e+00 : f32
    %339 = vector.broadcast %cst_71 : f32 to vector<2x128xf32>
    %340 = arith.mulf %339, %338 : vector<2x128xf32>
    %cst_72 = arith.constant 1.000000e+00 : f32
    %341 = vector.broadcast %cst_72 : f32 to vector<2x128xf32>
    %342 = arith.subf %340, %341 : vector<2x128xf32>
    %343 = arith.select %5, %342, %338 : vector<2x128xi1>, vector<2x128xf32>
    %344 = vector.extract_strided_slice %343 {offsets = [0, 0], sizes = [2, 32], strides = [1, 1]} : vector<2x128xf32> to vector<2x32xf32>
    %345 = vector.extract_strided_slice %343 {offsets = [0, 32], sizes = [2, 32], strides = [1, 1]} : vector<2x128xf32> to vector<2x32xf32>
    %346 = vector.extract_strided_slice %343 {offsets = [0, 64], sizes = [2, 32], strides = [1, 1]} : vector<2x128xf32> to vector<2x32xf32>
    %347 = vector.extract_strided_slice %343 {offsets = [0, 96], sizes = [2, 32], strides = [1, 1]} : vector<2x128xf32> to vector<2x32xf32>
    %348 = arith.mulf %345, %306 : vector<2x32xf32>
    %349 = arith.mulf %344, %346 : vector<2x32xf32>
    %350 = arith.addf %348, %349 : vector<2x32xf32>
    %351 = math.tanh %350 : vector<2x32xf32>
    %352 = arith.mulf %347, %351 : vector<2x32xf32>
    %353 = tpu.concatenate %352, %330 in 1 : vector<2x32xf32>, vector<2x32xf32> -> vector<2x64xf32>
    %cst_73 = arith.constant dense<0.000000e+00> : vector<2x128xf32>
    %354 = tpu.matmul %353, %9, %cst_73 {dimension_numbers = #tpu.dot_dimension_numbers<[1], [0], [0], [1], [0, 0, 1, 1], [], []>} : vector<2x64xf32>, vector<64x128xf32>, vector<2x128xf32> -> vector<2x128xf32>
    %355 = arith.addf %354, %12 : vector<2x128xf32>
    %356 = arith.negf %355 : vector<2x128xf32>
    %357 = math.exp %356 : vector<2x128xf32>
    %cst_74 = arith.constant 1.000000e+00 : f32
    %358 = vector.broadcast %cst_74 : f32 to vector<2x128xf32>
    %359 = arith.addf %358, %357 : vector<2x128xf32>
    %360 = arith.divf %358, %359 : vector<2x128xf32>
    %cst_75 = arith.constant 2.000000e+00 : f32
    %361 = vector.broadcast %cst_75 : f32 to vector<2x128xf32>
    %362 = arith.mulf %361, %360 : vector<2x128xf32>
    %cst_76 = arith.constant 1.000000e+00 : f32
    %363 = vector.broadcast %cst_76 : f32 to vector<2x128xf32>
    %364 = arith.subf %362, %363 : vector<2x128xf32>
    %365 = arith.select %5, %364, %360 : vector<2x128xi1>, vector<2x128xf32>
    %366 = vector.extract_strided_slice %365 {offsets = [0, 0], sizes = [2, 32], strides = [1, 1]} : vector<2x128xf32> to vector<2x32xf32>
    %367 = vector.extract_strided_slice %365 {offsets = [0, 32], sizes = [2, 32], strides = [1, 1]} : vector<2x128xf32> to vector<2x32xf32>
    %368 = vector.extract_strided_slice %365 {offsets = [0, 64], sizes = [2, 32], strides = [1, 1]} : vector<2x128xf32> to vector<2x32xf32>
    %369 = vector.extract_strided_slice %365 {offsets = [0, 96], sizes = [2, 32], strides = [1, 1]} : vector<2x128xf32> to vector<2x32xf32>
    %370 = arith.mulf %367, %328 : vector<2x32xf32>
    %371 = arith.mulf %366, %368 : vector<2x32xf32>
    %372 = arith.addf %370, %371 : vector<2x32xf32>
    %373 = math.tanh %372 : vector<2x32xf32>
    %374 = arith.mulf %369, %373 : vector<2x32xf32>
    %cst_77 = arith.constant dense<0.000000e+00> : vector<2x128xf32>
    %375 = tpu.matmul %374, %13, %cst_77 {dimension_numbers = #tpu.dot_dimension_numbers<[1], [0], [0], [1], [0, 0, 1, 1], [], []>} : vector<2x32xf32>, vector<32x128xf32>, vector<2x128xf32> -> vector<2x128xf32>
    %376 = vector.broadcast %14 : vector<1x128xf32> to vector<2x128xf32>
    %377 = arith.addf %375, %376 : vector<2x128xf32>
    %378 = vector.extract_strided_slice %377 {offsets = [0, 0], sizes = [2, 4], strides = [1, 1]} : vector<2x128xf32> to vector<2x4xf32>
    %c0_78 = arith.constant 0 : index
    %c0_79 = arith.constant 0 : index
    %379 = vector.load %arg2[%c0_78, %c0_79] : memref<2x4xf32, #tpu.memory_space<vmem>>, vector<2x4xf32>
    tpu.vector_store %arg2[%c0_78, %c0_79], %378 {strides = array<i32>} : memref<2x4xf32, #tpu.memory_space<vmem>>, vector<2x4xf32>,
    return
  }
}

</mosaic_0001>

<bundles_post_ra>
// kernel: lstm_forward.1
= control target key start
LH: loop header
LB: loop body
LE: loop exit
PB: predicated region body
PF: predicated region fallthrough
CT: control target
= control target key end

     0   :  { %7 = vsyncpa [#allocation3], 0  ;;  %s3029_s0 = inlined_call_operand.vmem [shape: f32[16,8], index: 0, kind: input, shape index: {}]   ;;  %s3030_s1 = inlined_call_operand.hbm [shape: f32[160,128], index: 1, kind: input, shape index: {}]   ;;  %s3031_s2 = inlined_call_operand.hbm [shape: f32[2,4], index: 2, kind: output, shape index: {}]  }
   0x1   :  { %8 = vsyncpa [#allocation4], 0  ;;  %s2550_s9 = smov [#allocation2]  }
   0x2   :  { %s16_s10 = sshll.u32 %s2550_s9, 4  ;;  %s17_s10 = int_to_ptr.vmem [resolvable:$true] %s16_s10 }
   0x3   :  { %s2514_s11 = scalar_lea.vmem %s17_s10, 2560  ;;  %p2519_p1 = scmp.lt.s32.totalorder %s17_s10, %s17_s10 }
   0x4   :  { %p2515_p0 = scmp.ne.s32.totalorder %s17_s10, %s2514_s11  ;;  %p2520_p2 = scmp.lt.s32.totalorder %s2514_s11, %s2514_s11 }
   0x6   :  { %p2521_p3 = por %p2520_p2, %p2519_p1 }
   0x8   :  { %p2522_p4 = pnand %p2521_p3, %p2515_p0 }
   0xa   :  { %2525 = shalt.err (!%p2522_p4)
}
   0xb   :  { %s2551_s12 = smov 128   ;;  %s2552_s13 = smov 8  }
   0xc   :  { %22 = dma.hbm_to_vmem [thread:$0]  %s3030_s1, 2560, %s17_s10, [#allocation3], %s2551_s12, %s2551_s12, %s2552_s13  }
   0xd   :  { %2546 = dma.done.wait [#allocation3], 2560  }
   0xe   :  { %2547 = vsyncadd [#allocation3], 4294964736  ;;  %v2553_v0 = vmov 0.0   ;;  %vm2554_vm0 = vmmov 0   ;;  %vm61_vm1 = vcmask 64512   ;;  %v31_v1 = vld [vmem:[#allocation2] sm:$0xff]  ;;  %v26_v19 = vlaneseq }
   0xf   :  { %2138 = vmatprep.subr.mxu1 %v2553_v0  ;;  %2146 = vmatprep.mubr.msk.f32.mxu1 %vm2554_vm0, %v2553_v0  ;;  %v2579_v2 = vld [vmem:[#allocation2 + $0x20] sm:$0xff]  ;;  %v56_v4 = vld [vmem:[%s3029_s0 + $0x8] sm:$0xff]  ;;  %v2588_v5 = vld [vmem:[#allocation2 + $0x18] sm:$0xff]  ;;  %s2556_s19 = smov 32   ;;  %vm143_vm5 = vcmask 261120   ;;  %vm249_vm6 = vcmask 523264  }
  0x10   :  { %v55_v3 = vld [vmem:[%s3029_s0] sm:$0xff]  ;;  %2133 = vmatprep.subr.mxu0 %v31_v1  ;;  %2139 = vmatpush3.msra.mxu1 %v2579_v2  ;;  %v2591_v6 = vld [vmem:[#allocation2 + $0x10] sm:$0xff]  ;;  %v2596_v7 = vld [vmem:[#allocation2 + $0x8] sm:$0xff]  ;;  %v27_v20 = vand.u32 127, %v26_v19  ;;  %s2555_s0 = smov 64   ;;  %s2557_s20 = smov [#allocation5]  }
  0x11   :  { %2134 = vmatpush3.msra.mxu0 %v31_v1  ;;  %2135 = vmatprep.mubr.msk.f32.mxu0 %vm61_vm1, %v55_v3  ;;  %v1961_v8 = vld [vmem:[#allocation2 + $0x28] ss:$0 sm:$0xff]  ;;  %v2633_v32 = vld [vmem:[#allocation2 + $0x60] sm:$0xff]  ;;  %v2637_v33 = vld [vmem:[#allocation2 + $0x58] sm:$0xff]  ;;  %s1951_s21 = sshll.u32 %s2557_s20, 4  ;;  %vm1943_vm7 = vcmask 25600   ;;  %s1952_s21 = int_to_ptr.vmem [resolvable:$true] %s1951_s21 }
  0x12   :  { %2140 = vmatprep.subr.mxu1 %v2553_v0  ;;  %2136 = vmatmul.mubr.msk.f32.vlgmr.msra.gmra.mxu0 %vm61_vm1, %v56_v4  ;;  %vm28_vm2 = vcmp.ge.s32.totalorder %v27_v20, 64  ;;  %vm29_vm3 = vcmp.lt.s32.totalorder %v27_v20, 96  ;;  %v2631_v31 = vld [vmem:[#allocation2 + $0x68] sm:$0xff]  ;;  %v2641_v34 = vld [vmem:[#allocation2 + $0x50] sm:$0xff]  ;;  %v2649_v36 = vld [vmem:[#allocation2 + $0x40] sm:$0xff]  ;;  %s2526_s22 = scalar_lea.vmem %s1952_s21, 32  ;;  %p2531_p6 = scmp.lt.s32.totalorder %s1952_s21, %s1952_s21 }
  0x13   :  { %2141 = vmatpush3.msra.mxu1 %v2588_v5  ;;  %2149 = vmatprep.subr.mxu0 %v2553_v0  ;;  %vm2620_vm4 = vmand %vm28_vm2, %vm29_vm3  ;;  %v2645_v35 = vld [vmem:[#allocation2 + $0x48] sm:$0xff]  ;;  %v2653_v38 = vld [vmem:[#allocation2 + $0x38] sm:$0xff]  ;;  %p2527_p5 = scmp.ne.s32.totalorder %s1952_s21, %s2526_s22  ;;  %p2532_p7 = scmp.lt.s32.totalorder %s2526_s22, %s2526_s22 }
  0x14   :  { %2142 = vmatprep.subr.mxu1 %v2553_v0  ;;  %2165 = vmatprep.mubr.msk.f32.mxu0 %vm2554_vm0, %v2553_v0  ;;  %v2660_v39 = vld [vmem:[#allocation2 + $0x30] sm:$0xff]  ;;  %v50_v23 = vld [vmem:[#allocation2 + $0x78] sm:$0xff] }
  0x15   :  { %2143 = vmatpush3.msra.mxu1 %v2591_v6  ;;  %2150 = vmatpush3.msra.mxu0 %v2631_v31  ;;  %v2696_v44 = vld [vmem:[#allocation2 + $0x70] ss:$0 sm:$0xff]  ;;  %p2533_p8 = por %p2532_p7, %p2531_p6 }
  0x16   :  { %2144 = vmatprep.subr.mxu1 %v2553_v0  ;;  %2151 = vmatprep.subr.mxu0 %v2553_v0 }
  0x17   :  { %2145 = vmatpush3.msra.mxu1 %v2596_v7  ;;  %2152 = vmatpush3.msra.mxu0 %v2633_v32  ;;  %p2534_p9 = pnand %p2533_p8, %p2527_p5 }
  0x18   :  { %2147 = vmatmul.mubr.f32.vlgmr.msra.gmra.mxu1 %v2553_v0  ;;  %2168 = vmatprep.subr.mxu1 %v2553_v0 }
  0x19   :  { %2169 = vmatpush3.msra.mxu1 %v2579_v2  ;;  %2176 = vmatprep.mubr.msk.f32.mxu1 %vm2554_vm0, %v2553_v0 }
  0x1a   :  { %2170 = vmatprep.subr.mxu1 %v2553_v0  ;;  %2153 = vmatprep.subr.mxu0 %v2553_v0 }
  0x1b   :  { %2171 = vmatpush3.msra.mxu1 %v2588_v5  ;;  %2154 = vmatpush3.msra.mxu0 %v2637_v33 }
  0x1c   :  { %2172 = vmatprep.subr.mxu1 %v2553_v0  ;;  %2155 = vmatprep.subr.mxu0 %v2553_v0 }
  0x1d   :  { %2173 = vmatpush3.msra.mxu1 %v2591_v6  ;;  %2156 = vmatpush3.msra.mxu0 %v2641_v34 }
  0x1e   :  { %2174 = vmatprep.subr.mxu1 %v2553_v0  ;;  %2157 = vmatprep.subr.mxu0 %v2553_v0 }
  0x1f   :  { %2175 = vmatpush3.msra.mxu1 %v2596_v7  ;;  %2158 = vmatpush3.msra.mxu0 %v2645_v35 }
  0x20   :  { %2179 = vmatprep.subr.mxu1 %v2553_v0  ;;  %2159 = vmatprep.subr.mxu0 %v2553_v0 }
  0x21   :  { %2160 = vmatpush3.msra.mxu0 %v2649_v36 }
  0x22   :  { %2161 = vmatprep.subr.mxu0 %v2553_v0 }
  0x23   :  { %2162 = vmatpush3.msra.mxu0 %v2653_v38 }
  0x24   :  { %2163 = vmatprep.subr.mxu0 %v2553_v0 }
  0x25   :  { %2164 = vmatpush3.msra.mxu0 %v2660_v39 }
  0x26   :  { %2198 = vmatprep.subr.mxu0 %v2553_v0 }
  0xd2   :  { %v2137_v9 = vpop.f32.mrf.mxu0 }
  0xd3   :  { %v2615_v10 = vadd.f32 %v2137_v9, %v1961_v8 }
  0xd4   :  { %v134_v11 = vpop.f32.mrf.mxu0 }
  0xd5   :  { %v2617_v12 = vadd.f32 %v1961_v8, %v134_v11 }
  0xd8   :  { %v213_v13 = vpop.f32.mrf.mxu1 }
  0xd9   :  { %v217_v14 = vadd.f32 %v213_v13, %v2617_v12 }
  0xda   :  { %v2148_v15 = vpop.f32.mrf.mxu1 }
  0xdb   :  { %v1964_v16 = vmul.f32 -1.442695, %v217_v14 }
  0xdd   :  { %2397 = vpow2.f32 %v1964_v16 }
  0xea   :  { %v2398_v17 = vpop.eup %2397 }
  0xeb   :  { %v221_v18 = vadd.f32 1.0, %v2398_v17 }
  0xed   :  { %2399 = vrcp.f32 %v221_v18 }
  0xfa   :  { %v2400_v21 = vpop.eup %2399 }
  0xfb   :  { %v224_v22 = vmul.f32 2.0, %v2400_v21 }
  0xfd   :  { %v1965_v24 = vadd.f32 -1.0, %v224_v22 }
  0xff   :  { %v226_v25 = vsel %vm2620_vm4, %v1965_v24, %v2400_v21 }
 0x100   :  { %229 = vrot.lane.b32.xlu0 %v226_v25, %s2555_s0  ;;  %v227_v28 = vmul.f32 0.0, %v226_v25 }
 0x172   :  { %v230_v26 = vpop.permute.xlu0 %229 }
 0x173   :  { %v232_v27 = vmul.f32 %v230_v26, %v226_v25 }
 0x175   :  { %234 = vrot.lane.b32.xlu0 %v232_v27, %s2556_s19 }
 0x1e7   :  { %v235_v29 = vpop.permute.xlu0 %234 }
 0x1e8   :  { %v2628_v30 = vadd.f32 %v235_v29, %v227_v28 }
 0x1ea   :  { %2401 = vtanh.f32 %v2628_v30  ;;  %v435_v13 = vrot.slane %v2628_v30, 6 }
 0x1f7   :  { %v2402_v37 = vpop.eup %2401 }
 0x1f8   :  { %240 = vrot.lane.b32.xlu1 %v2402_v37, %s2555_s0 }
 0x26a   :  { %v241_v40 = vpop.permute.xlu1 %240 }
 0x26b   :  { %v243_v41 = vmul.f32 %v241_v40, %v226_v25 }
 0x26d   :  { %245 = vrot.lane.b32.xlu1 %v243_v41, %s2556_s19 }
 0x2df   :  { %v246_v42 = vpop.permute.xlu1 %245 }
 0x2e0   :  { %v248_v43 = vsel %vm143_vm5, %v246_v42, 0.0  ;;  %2177 = vmatmul.mubr.msk.f32.vlgmr.msra.gmra.mxu1 %vm143_vm5, %v246_v42 }
 0x2e1   :  { %2166 = vmatmul.mubr.msk.f32.vlgmr.msra.gmra.mxu0 %vm249_vm6, %v248_v43  ;;  %2180 = vmatpush3.msra.mxu1 %v2631_v31 }
 0x2e2   :  { %2181 = vmatprep.subr.mxu1 %v2553_v0  ;;  %2199 = vmatpush3.msra.mxu0 %v2579_v2 }
 0x2e3   :  { %2182 = vmatpush3.msra.mxu1 %v2633_v32  ;;  %2200 = vmatprep.subr.mxu0 %v2553_v0 }
 0x2e4   :  { %2183 = vmatprep.subr.mxu1 %v2553_v0  ;;  %2201 = vmatpush3.msra.mxu0 %v2588_v5 }
 0x2e5   :  { %2184 = vmatpush3.msra.mxu1 %v2637_v33  ;;  %2202 = vmatprep.subr.mxu0 %v2553_v0 }
 0x2e6   :  { %2185 = vmatprep.subr.mxu1 %v2553_v0  ;;  %2203 = vmatpush3.msra.mxu0 %v2591_v6 }
 0x2e7   :  { %2186 = vmatpush3.msra.mxu1 %v2641_v34  ;;  %2204 = vmatprep.subr.mxu0 %v2553_v0 }
 0x2e8   :  { %2187 = vmatprep.subr.mxu1 %v2553_v0  ;;  %2195 = vmatprep.mubr.msk.f32.mxu1 %vm2554_vm0, %v2553_v0 }
 0x2e9   :  { %2188 = vmatpush3.msra.mxu1 %v2645_v35  ;;  %2205 = vmatpush3.msra.mxu0 %v2596_v7 }
 0x2ea   :  { %2189 = vmatprep.subr.mxu1 %v2553_v0  ;;  %2206 = vmatprep.mubr.msk.f32.mxu0 %vm2554_vm0, %v2553_v0 }
 0x2eb   :  { %2190 = vmatpush3.msra.mxu1 %v2649_v36  ;;  %2209 = vmatprep.subr.mxu0 %v2553_v0 }
 0x2ec   :  { %2191 = vmatprep.subr.mxu1 %v2553_v0 }
 0x2ed   :  { %2192 = vmatpush3.msra.mxu1 %v2653_v38 }
 0x2ee   :  { %2193 = vmatprep.subr.mxu1 %v2553_v0 }
 0x2ef   :  { %2194 = vmatpush3.msra.mxu1 %v2660_v39 }
 0x2f0   :  { %2228 = vmatprep.subr.mxu1 %v2553_v0 }
 0x3a0   :  { %v417_v45 = vpop.f32.mrf.mxu1 }
 0x3a1   :  { %v422_v46 = vrot.slane %v417_v45, 6  ;;  %v319_v47 = vpop.f32.mrf.mxu0 }
 0x3a2   :  { %v320_v48 = vadd.f32 %v2696_v44, %v319_v47  ;;  %v2178_v49 = vpop.f32.mrf.mxu1 }
 0x3a3   :  { %v424_v50 = vadd.f32 %v422_v46, %v2617_v12  ;;  %v2167_v51 = vpop.f32.mrf.mxu0 }
 0x3a4   :  { %v1967_v52 = vmul.f32 -1.442695, %v320_v48 }
 0x3a5   :  { %v1970_v53 = vmul.f32 -1.442695, %v424_v50 }
 0x3a6   :  { %2403 = vpow2.f32 %v1967_v52 }
 0x3a7   :  { %2405 = vpow2.f32 %v1970_v53 }
 0x3b3   :  { %v2404_v54 = vpop.eup %2403 }
 0x3b4   :  { %v2406_v55 = vpop.eup %2405  ;;  %v326_v56 = vadd.f32 1.0, %v2404_v54 }
 0x3b5   :  { %v428_v57 = vadd.f32 1.0, %v2406_v55 }
 0x3b6   :  { %2407 = vrcp.f32 %v326_v56 }
 0x3b7   :  { %2409 = vrcp.f32 %v428_v57 }
 0x3c3   :  { %v2408_v58 = vpop.eup %2407 }
 0x3c4   :  { %v2410_v59 = vpop.eup %2409  ;;  %v329_v60 = vmul.f32 2.0, %v2408_v58 }
 0x3c5   :  { %v431_v61 = vmul.f32 2.0, %v2410_v59 }
 0x3c6   :  { %v1968_v62 = vadd.f32 -1.0, %v329_v60 }
 0x3c7   :  { %v1971_v63 = vadd.f32 -1.0, %v431_v61 }
 0x3c8   :  { %v331_v1 = vsel %vm2620_vm4, %v1968_v62, %v2408_v58 }
 0x3c9   :  { %334 = vrot.lane.b32.xlu0 %v331_v1, %s2555_s0  ;;  %v433_v3 = vsel %vm2620_vm4, %v1971_v63, %v2410_v59  ;;  %v332_v14 = vmul.f32 0.0, %v331_v1 }
 0x3ca   :  { %439 = vrot.lane.b32.xlu1 %v433_v3, %s2555_s0  ;;  %v437_v16 = vmul.f32 %v435_v13, %v433_v3 }
 0x43b   :  { %v335_v4 = vpop.permute.xlu0 %334 }
 0x43c   :  { %v337_v8 = vmul.f32 %v335_v4, %v331_v1  ;;  %v440_v9 = vpop.permute.xlu1 %439 }
 0x43d   :  { %v442_v11 = vmul.f32 %v440_v9, %v433_v3 }
 0x43e   :  { %339 = vrot.lane.b32.xlu0 %v337_v8, %s2556_s19 }
 0x43f   :  { %444 = vrot.lane.b32.xlu1 %v442_v11, %s2556_s19 }
 0x4b0   :  { %v340_v15 = vpop.permute.xlu0 %339 }
 0x4b1   :  { %v2709_v17 = vadd.f32 %v340_v15, %v332_v14  ;;  %v445_v18 = vpop.permute.xlu1 %444 }
 0x4b2   :  { %v2711_v19 = vadd.f32 %v445_v18, %v437_v16 }
 0x4b3   :  { %2411 = vtanh.f32 %v2709_v17 }
 0x4b4   :  { %2413 = vtanh.f32 %v2711_v19  ;;  %v653_v9 = vrot.slane %v2711_v19, 6 }
 0x4c0   :  { %v2412_v20 = vpop.eup %2411 }
 0x4c1   :  { %v2414_v21 = vpop.eup %2413  ;;  %345 = vrot.lane.b32.xlu0 %v2412_v20, %s2555_s0 }
 0x4c2   :  { %450 = vrot.lane.b32.xlu1 %v2414_v21, %s2555_s0 }
 0x533   :  { %v346_v22 = vpop.permute.xlu0 %345 }
 0x534   :  { %v348_v24 = vmul.f32 %v346_v22, %v331_v1  ;;  %v451_v25 = vpop.permute.xlu1 %450 }
 0x535   :  { %v453_v26 = vmul.f32 %v451_v25, %v433_v3 }
 0x536   :  { %v459_v27 = vrot.slane %v348_v24, 6 }
 0x537   :  { %455 = vrot.lane.b32.xlu0 %v453_v26, %s2556_s19  ;;  %v564_v28 = vrot.slane %v453_v26, 2 }
 0x538   :  { %460 = vrot.lane.b32.xlu1 %v459_v27, %s2555_s0 }
 0x53b   :  { %565 = vrot.lane.b32.xlu0 %v564_v28, %s2556_s19 }
 0x5a9   :  { %v456_v29 = vpop.permute.xlu0 %455 }
 0x5aa   :  { %v461_v30 = vpop.permute.xlu1 %460 }
 0x5ab   :  { %v463_v37 = vsel %vm143_vm5, %v456_v29, %v461_v30 }
 0x5ac   :  { %v465_v40 = vrot.slane %v463_v37, 2 }
 0x5ad   :  { %v566_v41 = vpop.permute.xlu0 %565 }
 0x5ae   :  { %2196 = vmatmul.mubr.msk.f32.vlgmr.msra.gmra.mxu1 %vm249_vm6, %v465_v40  ;;  %2207 = vmatmul.mubr.msk.f32.vlgmr.msra.gmra.mxu0 %vm143_vm5, %v566_v41 }
 0x5af   :  { %2210 = vmatpush3.msra.mxu0 %v2631_v31  ;;  %2229 = vmatpush3.msra.mxu1 %v2579_v2 }
 0x5b0   :  { %2211 = vmatprep.subr.mxu0 %v2553_v0  ;;  %2230 = vmatprep.subr.mxu1 %v2553_v0 }
 0x5b1   :  { %2212 = vmatpush3.msra.mxu0 %v2633_v32  ;;  %2231 = vmatpush3.msra.mxu1 %v2588_v5 }
 0x5b2   :  { %2213 = vmatprep.subr.mxu0 %v2553_v0  ;;  %2232 = vmatprep.subr.mxu1 %v2553_v0 }
 0x5b3   :  { %2214 = vmatpush3.msra.mxu0 %v2637_v33  ;;  %2233 = vmatpush3.msra.mxu1 %v2591_v6 }
 0x5b4   :  { %2215 = vmatprep.subr.mxu0 %v2553_v0  ;;  %2225 = vmatprep.mubr.msk.f32.mxu0 %vm2554_vm0, %v2553_v0 }
 0x5b5   :  { %2216 = vmatpush3.msra.mxu0 %v2641_v34  ;;  %2234 = vmatprep.subr.mxu1 %v2553_v0 }
 0x5b6   :  { %2217 = vmatprep.subr.mxu0 %v2553_v0  ;;  %2235 = vmatpush3.msra.mxu1 %v2596_v7 }
 0x5b7   :  { %2218 = vmatpush3.msra.mxu0 %v2645_v35  ;;  %2236 = vmatprep.mubr.msk.f32.mxu1 %vm2554_vm0, %v2553_v0 }
 0x5b8   :  { %2219 = vmatprep.subr.mxu0 %v2553_v0  ;;  %2239 = vmatprep.subr.mxu1 %v2553_v0 }
 0x5b9   :  { %2220 = vmatpush3.msra.mxu0 %v2649_v36 }
 0x5ba   :  { %2221 = vmatprep.subr.mxu0 %v2553_v0 }
 0x5bb   :  { %2222 = vmatpush3.msra.mxu0 %v2653_v38 }
 0x5bc   :  { %2223 = vmatprep.subr.mxu0 %v2553_v0 }
 0x5bd   :  { %2224 = vmatpush3.msra.mxu0 %v2660_v39 }
 0x5be   :  { %2258 = vmatprep.subr.mxu0 %v2553_v0 }
 0x66e   :  { %v534_v42 = vpop.f32.mrf.mxu1  ;;  %v635_v43 = vpop.f32.mrf.mxu0 }
 0x66f   :  { %v535_v45 = vadd.f32 %v2696_v44, %v534_v42  ;;  %v640_v46 = vrot.slane %v635_v43, 4 }
 0x670   :  { %v2197_v47 = vpop.f32.mrf.mxu1  ;;  %v2208_v48 = vpop.f32.mrf.mxu0 }
 0x671   :  { %v1973_v49 = vmul.f32 -1.442695, %v535_v45  ;;  %v642_v50 = vadd.f32 %v640_v46, %v2617_v12 }
 0x673   :  { %2415 = vpow2.f32 %v1973_v49  ;;  %v1976_v51 = vmul.f32 -1.442695, %v642_v50 }
 0x675   :  { %2417 = vpow2.f32 %v1976_v51 }
 0x680   :  { %v2416_v52 = vpop.eup %2415 }
 0x681   :  { %v541_v53 = vadd.f32 1.0, %v2416_v52 }
 0x682   :  { %v2418_v54 = vpop.eup %2417 }
 0x683   :  { %2419 = vrcp.f32 %v541_v53  ;;  %v646_v55 = vadd.f32 1.0, %v2418_v54 }
 0x685   :  { %2421 = vrcp.f32 %v646_v55 }
 0x690   :  { %v2420_v56 = vpop.eup %2419 }
 0x691   :  { %v544_v57 = vmul.f32 2.0, %v2420_v56 }
 0x692   :  { %v2422_v58 = vpop.eup %2421 }
 0x693   :  { %v1974_v59 = vadd.f32 -1.0, %v544_v57  ;;  %v649_v60 = vmul.f32 2.0, %v2422_v58 }
 0x695   :  { %v546_v61 = vsel %vm2620_vm4, %v1974_v59, %v2420_v56  ;;  %v1977_v62 = vadd.f32 -1.0, %v649_v60 }
 0x696   :  { %549 = vrot.lane.b32.xlu1 %v546_v61, %s2555_s0  ;;  %v547_v11 = vmul.f32 %v546_v61, %v2709_v17 }
 0x697   :  { %v651_v63 = vsel %vm2620_vm4, %v1977_v62, %v2422_v58 }
 0x698   :  { %657 = vrot.lane.b32.xlu0 %v651_v63, %s2555_s0  ;;  %v655_v15 = vmul.f32 %v653_v9, %v651_v63 }
 0x708   :  { %v550_v1 = vpop.permute.xlu1 %549 }
 0x709   :  { %v552_v3 = vmul.f32 %v550_v1, %v546_v61 }
 0x70a   :  { %v658_v4 = vpop.permute.xlu0 %657 }
 0x70b   :  { %v660_v8 = vmul.f32 %v658_v4, %v651_v63  ;;  %554 = vrot.lane.b32.xlu1 %v552_v3, %s2556_s19 }
 0x70d   :  { %662 = vrot.lane.b32.xlu0 %v660_v8, %s2556_s19 }
 0x77d   :  { %v555_v13 = vpop.permute.xlu1 %554 }
 0x77e   :  { %v2763_v14 = vadd.f32 %v555_v13, %v547_v11 }
 0x77f   :  { %v663_v16 = vpop.permute.xlu0 %662 }
 0x780   :  { %2423 = vtanh.f32 %v2763_v14  ;;  %v2766_v18 = vadd.f32 %v663_v16, %v655_v15 }
 0x782   :  { %2425 = vtanh.f32 %v2766_v18  ;;  %v871_v4 = vrot.slane %v2766_v18, 6 }
 0x78d   :  { %v2424_v20 = vpop.eup %2423 }
 0x78e   :  { %560 = vrot.lane.b32.xlu1 %v2424_v20, %s2555_s0 }
 0x78f   :  { %v2426_v21 = vpop.eup %2425 }
 0x790   :  { %668 = vrot.lane.b32.xlu0 %v2426_v21, %s2555_s0 }
 0x800   :  { %v561_v19 = vpop.permute.xlu1 %560 }
 0x801   :  { %v563_v22 = vmul.f32 %v561_v19, %v546_v61 }
 0x802   :  { %v669_v17 = vpop.permute.xlu0 %668 }
 0x803   :  { %v677_v24 = vrot.slane %v563_v22, 4  ;;  %v671_v25 = vmul.f32 %v669_v17, %v651_v63 }
 0x805   :  { %678 = vrot.lane.b32.xlu0 %v677_v24, %s2555_s0  ;;  %673 = vrot.lane.b32.xlu1 %v671_v25, %s2556_s19  ;;  %v782_v26 = vrot.slane %v671_v25, 4 }
 0x809   :  { %783 = vrot.lane.b32.xlu1 %v782_v26, %s2556_s19 }
 0x877   :  { %v674_v27 = vpop.permute.xlu1 %673  ;;  %v679_v28 = vpop.permute.xlu0 %678 }
 0x878   :  { %v681_v29 = vsel %vm143_vm5, %v674_v27, %v679_v28 }
 0x879   :  { %v683_v30 = vrot.slane %v681_v29, 4 }
 0x87b   :  { %v784_v37 = vpop.permute.xlu1 %783  ;;  %2226 = vmatmul.mubr.msk.f32.vlgmr.msra.gmra.mxu0 %vm249_vm6, %v683_v30 }
 0x87c   :  { %2237 = vmatmul.mubr.msk.f32.vlgmr.msra.gmra.mxu1 %vm143_vm5, %v784_v37  ;;  %2259 = vmatpush3.msra.mxu0 %v2579_v2 }
 0x87d   :  { %2240 = vmatpush3.msra.mxu1 %v2631_v31  ;;  %2260 = vmatprep.subr.mxu0 %v2553_v0 }
 0x87e   :  { %2241 = vmatprep.subr.mxu1 %v2553_v0  ;;  %2261 = vmatpush3.msra.mxu0 %v2588_v5 }
 0x87f   :  { %2242 = vmatpush3.msra.mxu1 %v2633_v32  ;;  %2262 = vmatprep.subr.mxu0 %v2553_v0 }
 0x880   :  { %2243 = vmatprep.subr.mxu1 %v2553_v0  ;;  %2263 = vmatpush3.msra.mxu0 %v2591_v6 }
 0x881   :  { %2244 = vmatpush3.msra.mxu1 %v2637_v33  ;;  %2255 = vmatprep.mubr.msk.f32.mxu1 %vm2554_vm0, %v2553_v0 }
 0x882   :  { %2245 = vmatprep.subr.mxu1 %v2553_v0  ;;  %2264 = vmatprep.subr.mxu0 %v2553_v0 }
 0x883   :  { %2246 = vmatpush3.msra.mxu1 %v2641_v34  ;;  %2265 = vmatpush3.msra.mxu0 %v2596_v7 }
 0x884   :  { %2247 = vmatprep.subr.mxu1 %v2553_v0  ;;  %2266 = vmatprep.mubr.msk.f32.mxu0 %vm2554_vm0, %v2553_v0 }
 0x885   :  { %2248 = vmatpush3.msra.mxu1 %v2645_v35  ;;  %2269 = vmatprep.subr.mxu0 %v2553_v0 }
 0x886   :  { %2249 = vmatprep.subr.mxu1 %v2553_v0 }
 0x887   :  { %2250 = vmatpush3.msra.mxu1 %v2649_v36 }
 0x888   :  { %2251 = vmatprep.subr.mxu1 %v2553_v0 }
 0x889   :  { %2252 = vmatpush3.msra.mxu1 %v2653_v38 }
 0x88a   :  { %2253 = vmatprep.subr.mxu1 %v2553_v0 }
 0x88b   :  { %2254 = vmatpush3.msra.mxu1 %v2660_v39 }
 0x88c   :  { %2288 = vmatprep.subr.mxu1 %v2553_v0 }
 0x93b   :  { %v752_v40 = vpop.f32.mrf.mxu0 }
 0x93c   :  { %v753_v41 = vadd.f32 %v2696_v44, %v752_v40  ;;  %v853_v42 = vpop.f32.mrf.mxu1 }
 0x93d   :  { %v858_v43 = vrot.slane %v853_v42, 2  ;;  %v2227_v45 = vpop.f32.mrf.mxu0 }
 0x93e   :  { %v1979_v46 = vmul.f32 -1.442695, %v753_v41  ;;  %v2238_v47 = vpop.f32.mrf.mxu1 }
 0x93f   :  { %v860_v48 = vadd.f32 %v858_v43, %v2617_v12 }
 0x940   :  { %2427 = vpow2.f32 %v1979_v46 }
 0x941   :  { %v1982_v49 = vmul.f32 -1.442695, %v860_v48 }
 0x943   :  { %2429 = vpow2.f32 %v1982_v49 }
 0x94d   :  { %v2428_v50 = vpop.eup %2427 }
 0x94e   :  { %v759_v51 = vadd.f32 1.0, %v2428_v50 }
 0x950   :  { %v2430_v52 = vpop.eup %2429  ;;  %2431 = vrcp.f32 %v759_v51 }
 0x951   :  { %v864_v53 = vadd.f32 1.0, %v2430_v52 }
 0x953   :  { %2433 = vrcp.f32 %v864_v53 }
 0x95d   :  { %v2432_v54 = vpop.eup %2431 }
 0x95e   :  { %v762_v55 = vmul.f32 2.0, %v2432_v54 }
 0x960   :  { %v2434_v56 = vpop.eup %2433  ;;  %v1980_v57 = vadd.f32 -1.0, %v762_v55 }
 0x961   :  { %v867_v58 = vmul.f32 2.0, %v2434_v56 }
 0x962   :  { %v764_v59 = vsel %vm2620_vm4, %v1980_v57, %v2432_v54 }
 0x963   :  { %767 = vrot.lane.b32.xlu0 %v764_v59, %s2555_s0  ;;  %v1983_v12 = vadd.f32 -1.0, %v867_v58  ;;  %v765_v3 = vmul.f32 %v764_v59, %v2763_v14 }
 0x965   :  { %v869_v60 = vsel %vm2620_vm4, %v1983_v12, %v2434_v56 }
 0x966   :  { %875 = vrot.lane.b32.xlu1 %v869_v60, %s2555_s0  ;;  %v873_v11 = vmul.f32 %v871_v4, %v869_v60 }
 0x9d5   :  { %v768_v61 = vpop.permute.xlu0 %767 }
 0x9d6   :  { %v770_v62 = vmul.f32 %v768_v61, %v764_v59 }
 0x9d8   :  { %v876_v63 = vpop.permute.xlu1 %875  ;;  %772 = vrot.lane.b32.xlu0 %v770_v62, %s2556_s19 }
 0x9d9   :  { %v878_v1 = vmul.f32 %v876_v63, %v869_v60 }
 0x9db   :  { %880 = vrot.lane.b32.xlu1 %v878_v1, %s2556_s19 }
 0xa4a   :  { %v773_v8 = vpop.permute.xlu0 %772 }
 0xa4b   :  { %v2817_v9 = vadd.f32 %v773_v8, %v765_v3 }
 0xa4d   :  { %2435 = vtanh.f32 %v2817_v9  ;;  %v881_v13 = vpop.permute.xlu1 %880 }
 0xa4e   :  { %v2820_v15 = vadd.f32 %v881_v13, %v873_v11 }
 0xa50   :  { %2437 = vtanh.f32 %v2820_v15  ;;  %v1086_v61 = vrot.slane %v2820_v15, 6 }
 0xa5a   :  { %v2436_v16 = vpop.eup %2435 }
 0xa5b   :  { %778 = vrot.lane.b32.xlu0 %v2436_v16, %s2555_s0 }
 0xa5d   :  { %v2438_v20 = vpop.eup %2437 }
 0xa5e   :  { %886 = vrot.lane.b32.xlu1 %v2438_v20, %s2555_s0 }
 0xacd   :  { %v779_v14 = vpop.permute.xlu0 %778 }
 0xace   :  { %v781_v21 = vmul.f32 %v779_v14, %v764_v59 }
 0xad0   :  { %v895_v18 = vrot.slane %v781_v21, 2  ;;  %v887_v19 = vpop.permute.xlu1 %886 }
 0xad1   :  { %v889_v22 = vmul.f32 %v887_v19, %v869_v60 }
 0xad2   :  { %896 = vrot.lane.b32.xlu1 %v895_v18, %s2555_s0 }
 0xad3   :  { %891 = vrot.lane.b32.xlu0 %v889_v22, %s2556_s19  ;;  %v1000_v17 = vrot.slane %v889_v22, 6 }
 0xad7   :  { %1001 = vrot.lane.b32.xlu0 %v1000_v17, %s2556_s19 }
 0xb44   :  { %v897_v24 = vpop.permute.xlu1 %896 }
 0xb45   :  { %v892_v25 = vpop.permute.xlu0 %891 }
 0xb46   :  { %v899_v26 = vsel %vm143_vm5, %v892_v25, %v897_v24 }
 0xb47   :  { %v901_v27 = vrot.slane %v899_v26, 6 }
 0xb49   :  { %2256 = vmatmul.mubr.msk.f32.vlgmr.msra.gmra.mxu1 %vm249_vm6, %v901_v27  ;;  %v1002_v28 = vpop.permute.xlu0 %1001 }
 0xb4a   :  { %2267 = vmatmul.mubr.msk.f32.vlgmr.msra.gmra.mxu0 %vm143_vm5, %v1002_v28  ;;  %2289 = vmatpush3.msra.mxu1 %v2579_v2 }
 0xb4b   :  { %2270 = vmatpush3.msra.mxu0 %v2631_v31  ;;  %2290 = vmatprep.subr.mxu1 %v2553_v0 }
 0xb4c   :  { %2271 = vmatprep.subr.mxu0 %v2553_v0  ;;  %2291 = vmatpush3.msra.mxu1 %v2588_v5 }
 0xb4d   :  { %2272 = vmatpush3.msra.mxu0 %v2633_v32  ;;  %2292 = vmatprep.subr.mxu1 %v2553_v0 }
 0xb4e   :  { %2273 = vmatprep.subr.mxu0 %v2553_v0  ;;  %2293 = vmatpush3.msra.mxu1 %v2591_v6 }
 0xb4f   :  { %2274 = vmatpush3.msra.mxu0 %v2637_v33  ;;  %2294 = vmatprep.subr.mxu1 %v2553_v0 }
 0xb50   :  { %2275 = vmatprep.subr.mxu0 %v2553_v0  ;;  %2295 = vmatpush3.msra.mxu1 %v2596_v7 }
 0xb51   :  { %2276 = vmatpush3.msra.mxu0 %v2641_v34  ;;  %2296 = vmatprep.mubr.msk.f32.mxu1 %vm2554_vm0, %v2553_v0 }
 0xb52   :  { %2277 = vmatprep.subr.mxu0 %v2553_v0  ;;  %2285 = vmatprep.mubr.msk.f32.mxu0 %vm2554_vm0, %v2553_v0 }
 0xb53   :  { %2278 = vmatpush3.msra.mxu0 %v2645_v35  ;;  %2299 = vmatprep.subr.mxu1 %v2553_v0 }
 0xb54   :  { %2279 = vmatprep.subr.mxu0 %v2553_v0 }
 0xb55   :  { %2280 = vmatpush3.msra.mxu0 %v2649_v36 }
 0xb56   :  { %2281 = vmatprep.subr.mxu0 %v2553_v0 }
 0xb57   :  { %2282 = vmatpush3.msra.mxu0 %v2653_v38 }
 0xb58   :  { %2283 = vmatprep.subr.mxu0 %v2553_v0 }
 0xb59   :  { %2284 = vmatpush3.msra.mxu0 %v2660_v39 }
 0xb5a   :  { %2318 = vmatprep.subr.mxu0 %v2553_v0 }
 0xc09   :  { %v970_v29 = vpop.f32.mrf.mxu1 }
 0xc0a   :  { %v971_v30 = vadd.f32 %v2696_v44, %v970_v29  ;;  %v1071_v37 = vpop.f32.mrf.mxu0 }
 0xc0b   :  { %v1075_v40 = vadd.f32 %v1071_v37, %v2615_v10  ;;  %v2257_v41 = vpop.f32.mrf.mxu1 }
 0xc0c   :  { %v1985_v42 = vmul.f32 -1.442695, %v971_v30  ;;  %v2268_v43 = vpop.f32.mrf.mxu0 }
 0xc0d   :  { %v1988_v45 = vmul.f32 -1.442695, %v1075_v40 }
 0xc0e   :  { %2439 = vpow2.f32 %v1985_v42 }
 0xc0f   :  { %2441 = vpow2.f32 %v1988_v45 }
 0xc1b   :  { %v2440_v46 = vpop.eup %2439 }
 0xc1c   :  { %v2442_v47 = vpop.eup %2441  ;;  %v977_v48 = vadd.f32 1.0, %v2440_v46 }
 0xc1d   :  { %v1079_v49 = vadd.f32 1.0, %v2442_v47 }
 0xc1e   :  { %2443 = vrcp.f32 %v977_v48 }
 0xc1f   :  { %2445 = vrcp.f32 %v1079_v49 }
 0xc2b   :  { %v2444_v50 = vpop.eup %2443 }
 0xc2c   :  { %v2446_v51 = vpop.eup %2445  ;;  %v980_v52 = vmul.f32 2.0, %v2444_v50 }
 0xc2d   :  { %v1082_v53 = vmul.f32 2.0, %v2446_v51 }
 0xc2e   :  { %v1986_v54 = vadd.f32 -1.0, %v980_v52 }
 0xc2f   :  { %v1989_v55 = vadd.f32 -1.0, %v1082_v53 }
 0xc30   :  { %v982_v56 = vsel %vm2620_vm4, %v1986_v54, %v2444_v50 }
 0xc31   :  { %985 = vrot.lane.b32.xlu1 %v982_v56, %s2555_s0  ;;  %v1084_v57 = vsel %vm2620_vm4, %v1989_v55, %v2446_v51  ;;  %v983_v62 = vmul.f32 %v982_v56, %v2817_v9 }
 0xc32   :  { %1090 = vrot.lane.b32.xlu0 %v1084_v57, %s2555_s0  ;;  %v1088_v1 = vmul.f32 %v1086_v61, %v1084_v57 }
 0xca3   :  { %v986_v58 = vpop.permute.xlu1 %985 }
 0xca4   :  { %v988_v59 = vmul.f32 %v986_v58, %v982_v56  ;;  %v1091_v12 = vpop.permute.xlu0 %1090 }
 0xca5   :  { %v1093_v60 = vmul.f32 %v1091_v12, %v1084_v57 }
 0xca6   :  { %990 = vrot.lane.b32.xlu1 %v988_v59, %s2556_s19 }
 0xca7   :  { %1095 = vrot.lane.b32.xlu0 %v1093_v60, %s2556_s19 }
 0xd18   :  { %v991_v63 = vpop.permute.xlu1 %990 }
 0xd19   :  { %v2871_v3 = vadd.f32 %v991_v63, %v983_v62  ;;  %v1096_v4 = vpop.permute.xlu0 %1095 }
 0xd1a   :  { %v2873_v8 = vadd.f32 %v1096_v4, %v1088_v1 }
 0xd1b   :  { %2447 = vtanh.f32 %v2871_v3 }
 0xd1c   :  { %2449 = vtanh.f32 %v2873_v8  ;;  %v1299_v51 = vrot.slane %v2873_v8, 6 }
 0xd28   :  { %v2448_v11 = vpop.eup %2447 }
 0xd29   :  { %v2450_v13 = vpop.eup %2449  ;;  %996 = vrot.lane.b32.xlu1 %v2448_v11, %s2555_s0 }
 0xd2a   :  { %1101 = vrot.lane.b32.xlu0 %v2450_v13, %s2555_s0 }
 0xd9b   :  { %v997_v15 = vpop.permute.xlu1 %996 }
 0xd9c   :  { %v999_v16 = vmul.f32 %v997_v15, %v982_v56  ;;  %v1102_v9 = vpop.permute.xlu0 %1101  ;;  %v2493_v15 = vld [vmem:[#allocation2 + $0x20] sm:$0xff] }
 0xd9d   :  { %v1104_v20 = vmul.f32 %v1102_v9, %v1084_v57  ;;  %v2495_v9 = vld [vmem:[#allocation2 + $0x10] sm:$0xff] }
 0xd9e   :  { %1110 = vrot.lane.b32.xlu0 %v999_v16, %s2555_s0  ;;  %v2494_v16 = vld [vmem:[#allocation2 + $0x18] sm:$0xff] }
 0xd9f   :  { %1106 = vrot.lane.b32.xlu1 %v1104_v20, %s2556_s19 }
 0xe10   :  { %v1111_v14 = vpop.permute.xlu0 %1110 }
 0xe11   :  { %v1107_v21 = vpop.permute.xlu1 %1106 }
 0xe12   :  { %v1113_v18 = vsel %vm143_vm5, %v1107_v21, %v1111_v14  ;;  %2297 = vmatmul.mubr.msk.f32.vlgmr.msra.gmra.mxu1 %vm143_vm5, %v1107_v21 }
 0xe13   :  { %2286 = vmatmul.mubr.msk.f32.vlgmr.msra.gmra.mxu0 %vm249_vm6, %v1113_v18  ;;  %2300 = vmatpush3.msra.mxu1 %v2631_v31 }
 0xe14   :  { %2301 = vmatprep.subr.mxu1 %v2553_v0  ;;  %2319 = vmatpush3.msra.mxu0 %v2579_v2 }
 0xe15   :  { %2302 = vmatpush3.msra.mxu1 %v2633_v32  ;;  %2320 = vmatprep.subr.mxu0 %v2553_v0 }
 0xe16   :  { %2303 = vmatprep.subr.mxu1 %v2553_v0  ;;  %2321 = vmatpush3.msra.mxu0 %v2588_v5 }
 0xe17   :  { %2304 = vmatpush3.msra.mxu1 %v2637_v33  ;;  %2322 = vmatprep.subr.mxu0 %v2553_v0 }
 0xe18   :  { %2305 = vmatprep.subr.mxu1 %v2553_v0  ;;  %2323 = vmatpush3.msra.mxu0 %v2591_v6 }
 0xe19   :  { %2306 = vmatpush3.msra.mxu1 %v2641_v34  ;;  %2324 = vmatprep.subr.mxu0 %v2553_v0 }
 0xe1a   :  { %2307 = vmatprep.subr.mxu1 %v2553_v0  ;;  %2315 = vmatprep.mubr.msk.f32.mxu1 %vm2554_vm0, %v2553_v0 }
 0xe1b   :  { %2308 = vmatpush3.msra.mxu1 %v2645_v35  ;;  %2325 = vmatpush3.msra.mxu0 %v2596_v7 }
 0xe1c   :  { %2309 = vmatprep.subr.mxu1 %v2553_v0  ;;  %2326 = vmatprep.mubr.msk.f32.mxu0 %vm2554_vm0, %v2553_v0 }
 0xe1d   :  { %2310 = vmatpush3.msra.mxu1 %v2649_v36  ;;  %2329 = vmatprep.subr.mxu0 %v2553_v0 }
 0xe1e   :  { %2311 = vmatprep.subr.mxu1 %v2553_v0 }
 0xe1f   :  { %2312 = vmatpush3.msra.mxu1 %v2653_v38 }
 0xe20   :  { %2313 = vmatprep.subr.mxu1 %v2553_v0 }
 0xe21   :  { %2314 = vmatpush3.msra.mxu1 %v2660_v39 }
 0xe22   :  { %2348 = vmatprep.subr.mxu1 %v2553_v0 }
 0xed2   :  { %v1281_v2 = vpop.f32.mrf.mxu1 }
 0xed3   :  { %v1286_v5 = vrot.slane %v1281_v2, 6  ;;  %v1183_v6 = vpop.f32.mrf.mxu0 }
 0xed4   :  { %v1184_v7 = vadd.f32 %v2696_v44, %v1183_v6  ;;  %v2298_v19 = vpop.f32.mrf.mxu1 }
 0xed5   :  { %v1288_v22 = vadd.f32 %v1286_v5, %v2615_v10  ;;  %v2287_v17 = vpop.f32.mrf.mxu0 }
 0xed6   :  { %v1991_v24 = vmul.f32 -1.442695, %v1184_v7 }
 0xed7   :  { %v1994_v25 = vmul.f32 -1.442695, %v1288_v22 }
 0xed8   :  { %2451 = vpow2.f32 %v1991_v24 }
 0xed9   :  { %2453 = vpow2.f32 %v1994_v25 }
 0xee5   :  { %v2452_v26 = vpop.eup %2451 }
 0xee6   :  { %v2454_v27 = vpop.eup %2453  ;;  %v1190_v28 = vadd.f32 1.0, %v2452_v26 }
 0xee7   :  { %v1292_v29 = vadd.f32 1.0, %v2454_v27 }
 0xee8   :  { %2455 = vrcp.f32 %v1190_v28 }
 0xee9   :  { %2457 = vrcp.f32 %v1292_v29 }
 0xef5   :  { %v2456_v30 = vpop.eup %2455 }
 0xef6   :  { %v2458_v37 = vpop.eup %2457  ;;  %v1193_v40 = vmul.f32 2.0, %v2456_v30 }
 0xef7   :  { %v1295_v41 = vmul.f32 2.0, %v2458_v37 }
 0xef8   :  { %v1992_v42 = vadd.f32 -1.0, %v1193_v40 }
 0xef9   :  { %v1995_v43 = vadd.f32 -1.0, %v1295_v41 }
 0xefa   :  { %v1195_v45 = vsel %vm2620_vm4, %v1992_v42, %v2456_v30 }
 0xefb   :  { %1198 = vrot.lane.b32.xlu1 %v1195_v45, %s2555_s0  ;;  %v1297_v46 = vsel %vm2620_vm4, %v1995_v43, %v2458_v37  ;;  %v1196_v52 = vmul.f32 %v1195_v45, %v2871_v3 }
 0xefc   :  { %1303 = vrot.lane.b32.xlu0 %v1297_v46, %s2555_s0  ;;  %v1301_v54 = vmul.f32 %v1299_v51, %v1297_v46 }
 0xf6d   :  { %v1199_v47 = vpop.permute.xlu1 %1198 }
 0xf6e   :  { %v1201_v48 = vmul.f32 %v1199_v47, %v1195_v45  ;;  %v1304_v49 = vpop.permute.xlu0 %1303 }
 0xf6f   :  { %v1306_v50 = vmul.f32 %v1304_v49, %v1297_v46 }
 0xf70   :  { %1203 = vrot.lane.b32.xlu1 %v1201_v48, %s2556_s19 }
 0xf71   :  { %1308 = vrot.lane.b32.xlu0 %v1306_v50, %s2556_s19 }
 0xfe2   :  { %v1204_v53 = vpop.permute.xlu1 %1203 }
 0xfe3   :  { %v2924_v55 = vadd.f32 %v1204_v53, %v1196_v52  ;;  %v1309_v56 = vpop.permute.xlu0 %1308 }
 0xfe4   :  { %v2926_v57 = vadd.f32 %v1309_v56, %v1301_v54 }
 0xfe5   :  { %2459 = vtanh.f32 %v2924_v55 }
 0xfe6   :  { %2461 = vtanh.f32 %v2926_v57  ;;  %v1517_v30 = vrot.slane %v2926_v57, 6 }
 0xff2   :  { %v2460_v58 = vpop.eup %2459 }
 0xff3   :  { %v2462_v59 = vpop.eup %2461  ;;  %1209 = vrot.lane.b32.xlu1 %v2460_v58, %s2555_s0 }
 0xff4   :  { %1314 = vrot.lane.b32.xlu0 %v2462_v59, %s2555_s0  ;;  %v2497_v59 = vld [vmem:[#allocation2 + $0x68] sm:$0xff] }
0x1065   :  { %v1210_v12 = vpop.permute.xlu1 %1209 }
0x1066   :  { %v1212_v60 = vmul.f32 %v1210_v12, %v1195_v45  ;;  %v1315_v61 = vpop.permute.xlu0 %1314  ;;  %v2498_v12 = vld [vmem:[#allocation2 + $0x60] sm:$0xff] }
0x1067   :  { %v1317_v62 = vmul.f32 %v1315_v61, %v1297_v46  ;;  %v2500_v61 = vld [vmem:[#allocation2 + $0x50] sm:$0xff] }
0x1068   :  { %v1323_v63 = vrot.slane %v1212_v60, 6  ;;  %v2499_v60 = vld [vmem:[#allocation2 + $0x58] sm:$0xff] }
0x1069   :  { %1319 = vrot.lane.b32.xlu1 %v1317_v62, %s2556_s19  ;;  %v1428_v1 = vrot.slane %v1317_v62, 2  ;;  %v2501_v62 = vld [vmem:[#allocation2 + $0x48] sm:$0xff] }
0x106a   :  { %1324 = vrot.lane.b32.xlu0 %v1323_v63, %s2555_s0  ;;  %v2502_v63 = vld [vmem:[#allocation2 + $0x40] sm:$0xff] }
0x106d   :  { %1429 = vrot.lane.b32.xlu1 %v1428_v1, %s2556_s19  ;;  %v2503_v1 = vld [vmem:[#allocation2 + $0x38] sm:$0xff] }
0x10db   :  { %v1320_v3 = vpop.permute.xlu1 %1319 }
0x10dc   :  { %v1325_v4 = vpop.permute.xlu0 %1324 }
0x10dd   :  { %v1327_v8 = vsel %vm143_vm5, %v1320_v3, %v1325_v4  ;;  %v2504_v3 = vld [vmem:[#allocation2 + $0x30] sm:$0xff] }
0x10de   :  { %v1329_v11 = vrot.slane %v1327_v8, 2  ;;  %v2505_v8 = vld [vmem:[#allocation2 + $0x70] ss:$0 sm:$0xff] }
0x10df   :  { %v1430_v13 = vpop.permute.xlu1 %1429 }
0x10e0   :  { %2316 = vmatmul.mubr.msk.f32.vlgmr.msra.gmra.mxu1 %vm249_vm6, %v1329_v11  ;;  %2327 = vmatmul.mubr.msk.f32.vlgmr.msra.gmra.mxu0 %vm143_vm5, %v1430_v13 }
0x10e1   :  { %2330 = vmatpush3.msra.mxu0 %v2631_v31  ;;  %2349 = vmatpush3.msra.mxu1 %v2493_v15  ;;  %v2496_v31 = vld [vmem:[#allocation2 + $0x8] sm:$0xff] }
0x10e2   :  { %2331 = vmatprep.subr.mxu0 %v2553_v0  ;;  %2350 = vmatprep.subr.mxu1 %v2553_v0 }
0x10e3   :  { %2332 = vmatpush3.msra.mxu0 %v2633_v32  ;;  %2351 = vmatpush3.msra.mxu1 %v2494_v16 }
0x10e4   :  { %2333 = vmatprep.subr.mxu0 %v2553_v0  ;;  %2352 = vmatprep.subr.mxu1 %v2553_v0 }
0x10e5   :  { %2334 = vmatpush3.msra.mxu0 %v2637_v33  ;;  %2353 = vmatpush3.msra.mxu1 %v2495_v9 }
0x10e6   :  { %2335 = vmatprep.subr.mxu0 %v2553_v0  ;;  %2345 = vmatprep.mubr.msk.f32.mxu0 %vm2554_vm0, %v2553_v0 }
0x10e7   :  { %2336 = vmatpush3.msra.mxu0 %v2641_v34  ;;  %2354 = vmatprep.subr.mxu1 %v2553_v0 }
0x10e8   :  { %2337 = vmatprep.subr.mxu0 %v2553_v0  ;;  %2355 = vmatpush3.msra.mxu1 %v2496_v31 }
0x10e9   :  { %2338 = vmatpush3.msra.mxu0 %v2645_v35  ;;  %2356 = vmatprep.mubr.msk.f32.mxu1 %vm2554_vm0, %v2553_v0 }
0x10ea   :  { %2339 = vmatprep.subr.mxu0 %v2553_v0  ;;  %2359 = vmatprep.subr.mxu1 %v2553_v0 }
0x10eb   :  { %2340 = vmatpush3.msra.mxu0 %v2649_v36 }
0x10ec   :  { %2341 = vmatprep.subr.mxu0 %v2553_v0 }
0x10ed   :  { %2342 = vmatpush3.msra.mxu0 %v2653_v38 }
0x10ee   :  { %2343 = vmatprep.subr.mxu0 %v2553_v0 }
0x10ef   :  { %2344 = vmatpush3.msra.mxu0 %v2660_v39 }
0x10f0   :  { %2378 = vmatprep.subr.mxu0 %v2553_v0 }
0x11a0   :  { %v1398_v32 = vpop.f32.mrf.mxu1  ;;  %v1499_v33 = vpop.f32.mrf.mxu0 }
0x11a1   :  { %v1399_v34 = vadd.f32 %v2696_v44, %v1398_v32  ;;  %v1504_v35 = vrot.slane %v1499_v33, 4 }
0x11a2   :  { %v2317_v20 = vpop.f32.mrf.mxu1  ;;  %v2328_v14 = vpop.f32.mrf.mxu0 }
0x11a3   :  { %v1997_v21 = vmul.f32 -1.442695, %v1399_v34  ;;  %v1506_v36 = vadd.f32 %v1504_v35, %v2615_v10 }
0x11a5   :  { %2463 = vpow2.f32 %v1997_v21  ;;  %v2000_v18 = vmul.f32 -1.442695, %v1506_v36 }
0x11a7   :  { %2465 = vpow2.f32 %v2000_v18 }
0x11b2   :  { %v2464_v38 = vpop.eup %2463 }
0x11b3   :  { %v1405_v2 = vadd.f32 1.0, %v2464_v38 }
0x11b4   :  { %v2466_v5 = vpop.eup %2465 }
0x11b5   :  { %2467 = vrcp.f32 %v1405_v2  ;;  %v1510_v39 = vadd.f32 1.0, %v2466_v5 }
0x11b7   :  { %2469 = vrcp.f32 %v1510_v39 }
0x11c2   :  { %v2468_v6 = vpop.eup %2467 }
0x11c3   :  { %v1408_v7 = vmul.f32 2.0, %v2468_v6 }
0x11c4   :  { %v2470_v19 = vpop.eup %2469 }
0x11c5   :  { %v1998_v22 = vadd.f32 -1.0, %v1408_v7  ;;  %v1513_v44 = vmul.f32 2.0, %v2470_v19 }
0x11c7   :  { %v1410_v17 = vsel %vm2620_vm4, %v1998_v22, %v2468_v6  ;;  %v2001_v24 = vadd.f32 -1.0, %v1513_v44 }
0x11c8   :  { %1413 = vrot.lane.b32.xlu0 %v1410_v17, %s2555_s0  ;;  %v1411_v37 = vmul.f32 %v1410_v17, %v2924_v55 }
0x11c9   :  { %v1515_v25 = vsel %vm2620_vm4, %v2001_v24, %v2470_v19 }
0x11ca   :  { %1521 = vrot.lane.b32.xlu1 %v1515_v25, %s2555_s0  ;;  %v1519_v42 = vmul.f32 %v1517_v30, %v1515_v25 }
0x123a   :  { %v1414_v26 = vpop.permute.xlu0 %1413 }
0x123b   :  { %v1416_v27 = vmul.f32 %v1414_v26, %v1410_v17 }
0x123c   :  { %v1522_v28 = vpop.permute.xlu1 %1521 }
0x123d   :  { %v1524_v29 = vmul.f32 %v1522_v28, %v1515_v25  ;;  %1418 = vrot.lane.b32.xlu0 %v1416_v27, %s2556_s19 }
0x123f   :  { %1526 = vrot.lane.b32.xlu1 %v1524_v29, %s2556_s19 }
0x12af   :  { %v1419_v40 = vpop.permute.xlu0 %1418 }
0x12b0   :  { %v2974_v41 = vadd.f32 %v1419_v40, %v1411_v37 }
0x12b1   :  { %v1527_v43 = vpop.permute.xlu1 %1526 }
0x12b2   :  { %2471 = vtanh.f32 %v2974_v41  ;;  %v2977_v45 = vadd.f32 %v1527_v43, %v1519_v42 }
0x12b4   :  { %2473 = vtanh.f32 %v2977_v45 }
0x12bf   :  { %v2472_v46 = vpop.eup %2471 }
0x12c0   :  { %1424 = vrot.lane.b32.xlu0 %v2472_v46, %s2555_s0 }
0x12c1   :  { %v2474_v47 = vpop.eup %2473 }
0x12c2   :  { %1532 = vrot.lane.b32.xlu1 %v2474_v47, %s2555_s0 }
0x1332   :  { %v1425_v48 = vpop.permute.xlu0 %1424 }
0x1333   :  { %v1427_v49 = vmul.f32 %v1425_v48, %v1410_v17  ;;  %v1735_v17 = vrot.slane %v2977_v45, 6 }
0x1334   :  { %v1533_v50 = vpop.permute.xlu1 %1532 }
0x1335   :  { %v1541_v51 = vrot.slane %v1427_v49, 4  ;;  %v1535_v52 = vmul.f32 %v1533_v50, %v1515_v25 }
0x1337   :  { %1542 = vrot.lane.b32.xlu1 %v1541_v51, %s2555_s0  ;;  %1537 = vrot.lane.b32.xlu0 %v1535_v52, %s2556_s19  ;;  %v1646_v53 = vrot.slane %v1535_v52, 4 }
0x133b   :  { %1647 = vrot.lane.b32.xlu0 %v1646_v53, %s2556_s19 }
0x13a9   :  { %v1538_v54 = vpop.permute.xlu0 %1537  ;;  %v1543_v55 = vpop.permute.xlu1 %1542 }
0x13aa   :  { %v1545_v56 = vsel %vm143_vm5, %v1538_v54, %v1543_v55 }
0x13ab   :  { %v1547_v57 = vrot.slane %v1545_v56, 4 }
0x13ad   :  { %v1648_v58 = vpop.permute.xlu0 %1647  ;;  %2346 = vmatmul.mubr.msk.f32.vlgmr.msra.gmra.mxu0 %vm249_vm6, %v1547_v57 }
0x13ae   :  { %2357 = vmatmul.mubr.msk.f32.vlgmr.msra.gmra.mxu1 %vm143_vm5, %v1648_v58  ;;  %2386 = vmatprep.mubr.msk.f32.mxu0 %vm2554_vm0, %v2553_v0 }
0x13af   :  { %2360 = vmatpush3.msra.mxu1 %v2497_v59  ;;  %2375 = vmatprep.mubr.msk.f32.mxu1 %vm2554_vm0, %v2553_v0 }
0x13b0   :  { %2361 = vmatprep.subr.mxu1 %v2553_v0 }
0x13b1   :  { %2362 = vmatpush3.msra.mxu1 %v2498_v12 }
0x13b2   :  { %2363 = vmatprep.subr.mxu1 %v2553_v0 }
0x13b3   :  { %2364 = vmatpush3.msra.mxu1 %v2499_v60 }
0x13b4   :  { %2365 = vmatprep.subr.mxu1 %v2553_v0 }
0x13b5   :  { %2366 = vmatpush3.msra.mxu1 %v2500_v61 }
0x13b6   :  { %2367 = vmatprep.subr.mxu1 %v2553_v0 }
0x13b7   :  { %2368 = vmatpush3.msra.mxu1 %v2501_v62 }
0x13b8   :  { %2369 = vmatprep.subr.mxu1 %v2553_v0 }
0x13b9   :  { %2370 = vmatpush3.msra.mxu1 %v2502_v63  ;;  %v53_v63 = vld [vmem:[#allocation2 + $0x90] sm:$0xff] }
0x13ba   :  { %2371 = vmatprep.subr.mxu1 %v2553_v0  ;;  %2379 = vmatpush3.msra.mxu0 %v53_v63 }
0x13bb   :  { %2372 = vmatpush3.msra.mxu1 %v2503_v1  ;;  %v52_v1 = vld [vmem:[#allocation2 + $0x88] sm:$0xff]  ;;  %2380 = vmatprep.subr.mxu0 %v2553_v0 }
0x13bc   :  { %2373 = vmatprep.subr.mxu1 %v2553_v0  ;;  %2381 = vmatpush3.msra.mxu0 %v52_v1 }
0x13bd   :  { %2374 = vmatpush3.msra.mxu1 %v2504_v3  ;;  %v51_v3 = vld [vmem:[#allocation2 + $0x80] sm:$0xff]  ;;  %2382 = vmatprep.subr.mxu0 %v2553_v0 }
0x13be   :  { %2383 = vmatpush3.msra.mxu0 %v51_v3 }
0x13bf   :  { %2384 = vmatprep.subr.mxu0 %v2553_v0 }
0x13c0   :  { %2385 = vmatpush3.msra.mxu0 %v50_v23 }
0x146d   :  { %v1616_v4 = vpop.f32.mrf.mxu0 }
0x146e   :  { %v1617_v11 = vadd.f32 %v2505_v8, %v1616_v4  ;;  %v1717_v13 = vpop.f32.mrf.mxu1 }
0x146f   :  { %v1722_v15 = vrot.slane %v1717_v13, 2  ;;  %v2347_v16 = vpop.f32.mrf.mxu0 }
0x1470   :  { %v2003_v9 = vmul.f32 -1.442695, %v1617_v11  ;;  %v2358_v31 = vpop.f32.mrf.mxu1 }
0x1471   :  { %v1724_v32 = vadd.f32 %v1722_v15, %v2615_v10  ;;  %v2011_v15 = vld [vmem:[#allocation2 + $0x98] ss:$0 sm:$0xff] }
0x1472   :  { %2475 = vpow2.f32 %v2003_v9 }
0x1473   :  { %v2006_v33 = vmul.f32 -1.442695, %v1724_v32 }
0x1475   :  { %2477 = vpow2.f32 %v2006_v33 }
0x147f   :  { %v2476_v34 = vpop.eup %2475 }
0x1480   :  { %v1623_v35 = vadd.f32 1.0, %v2476_v34 }
0x1482   :  { %v2478_v20 = vpop.eup %2477  ;;  %2479 = vrcp.f32 %v1623_v35 }
0x1483   :  { %v1728_v14 = vadd.f32 1.0, %v2478_v20 }
0x1485   :  { %2481 = vrcp.f32 %v1728_v14 }
0x148f   :  { %v2480_v21 = vpop.eup %2479 }
0x1490   :  { %v1626_v36 = vmul.f32 2.0, %v2480_v21 }
0x1492   :  { %v2482_v18 = vpop.eup %2481  ;;  %v2004_v38 = vadd.f32 -1.0, %v1626_v36 }
0x1493   :  { %v1731_v2 = vmul.f32 2.0, %v2482_v18 }
0x1494   :  { %v1628_v5 = vsel %vm2620_vm4, %v2004_v38, %v2480_v21 }
0x1495   :  { %1631 = vrot.lane.b32.xlu1 %v1628_v5, %s2555_s0  ;;  %v2007_v10 = vadd.f32 -1.0, %v1731_v2  ;;  %v1629_v44 = vmul.f32 %v1628_v5, %v2974_v41 }
0x1497   :  { %v1733_v39 = vsel %vm2620_vm4, %v2007_v10, %v2482_v18 }
0x1498   :  { %1739 = vrot.lane.b32.xlu0 %v1733_v39, %s2555_s0  ;;  %v1737_v26 = vmul.f32 %v1735_v17, %v1733_v39 }
0x1507   :  { %v1632_v6 = vpop.permute.xlu1 %1631 }
0x1508   :  { %v1634_v7 = vmul.f32 %v1632_v6, %v1628_v5 }
0x150a   :  { %v1740_v19 = vpop.permute.xlu0 %1739  ;;  %1636 = vrot.lane.b32.xlu1 %v1634_v7, %s2556_s19 }
0x150b   :  { %v1742_v22 = vmul.f32 %v1740_v19, %v1733_v39 }
0x150d   :  { %1744 = vrot.lane.b32.xlu0 %v1742_v22, %s2556_s19 }
0x157c   :  { %v1637_v24 = vpop.permute.xlu1 %1636 }
0x157d   :  { %v1639_v25 = vadd.f32 %v1637_v24, %v1629_v44 }
0x157f   :  { %2483 = vtanh.f32 %v1639_v25  ;;  %v1745_v27 = vpop.permute.xlu0 %1744 }
0x1580   :  { %v1747_v28 = vadd.f32 %v1745_v27, %v1737_v26 }
0x1582   :  { %2485 = vtanh.f32 %v1747_v28 }
0x158c   :  { %v2484_v29 = vpop.eup %2483 }
0x158d   :  { %1642 = vrot.lane.b32.xlu1 %v2484_v29, %s2555_s0 }
0x158f   :  { %v2486_v30 = vpop.eup %2485 }
0x1590   :  { %1750 = vrot.lane.b32.xlu0 %v2486_v30, %s2555_s0 }
0x15ff   :  { %v1643_v37 = vpop.permute.xlu1 %1642 }
0x1600   :  { %v1645_v40 = vmul.f32 %v1643_v37, %v1628_v5 }
0x1602   :  { %v1759_v42 = vrot.slane %v1645_v40, 2  ;;  %v1751_v43 = vpop.permute.xlu0 %1750 }
0x1603   :  { %v1753_v41 = vmul.f32 %v1751_v43, %v1733_v39 }
0x1604   :  { %1760 = vrot.lane.b32.xlu0 %v1759_v42, %s2555_s0 }
0x1605   :  { %1755 = vrot.lane.b32.xlu1 %v1753_v41, %s2556_s19 }
0x1676   :  { %v1761_v45 = vpop.permute.xlu0 %1760 }
0x1677   :  { %v1756_v46 = vpop.permute.xlu1 %1755 }
0x1678   :  { %v1763_v47 = vsel %vm143_vm5, %v1756_v46, %v1761_v45 }
0x1679   :  { %v1765_v48 = vrot.slane %v1763_v47, 6 }
0x167b   :  { %2376 = vmatmul.mubr.msk.f32.vlgmr.msra.gmra.mxu1 %vm249_vm6, %v1765_v48 }
0x173b   :  { %v1834_v49 = vpop.f32.mrf.mxu1 }
0x173c   :  { %v1835_v50 = vadd.f32 %v2505_v8, %v1834_v49 }
0x173d   :  { %v2377_v51 = vpop.f32.mrf.mxu1 }
0x173e   :  { %v2009_v52 = vmul.f32 -1.442695, %v1835_v50 }
0x1740   :  { %2487 = vpow2.f32 %v2009_v52 }
0x174d   :  { %v2488_v53 = vpop.eup %2487 }
0x174e   :  { %v1841_v54 = vadd.f32 1.0, %v2488_v53 }
0x1750   :  { %2489 = vrcp.f32 %v1841_v54 }
0x175d   :  { %v2490_v55 = vpop.eup %2489 }
0x175e   :  { %v1844_v56 = vmul.f32 2.0, %v2490_v55 }
0x1760   :  { %v2010_v57 = vadd.f32 -1.0, %v1844_v56 }
0x1762   :  { %v1846_v58 = vsel %vm2620_vm4, %v2010_v57, %v2490_v55 }
0x1763   :  { %1849 = vrot.lane.b32.xlu1 %v1846_v58, %s2555_s0  ;;  %v1847_v60 = vmul.f32 %v1846_v58, %v1639_v25 }
0x17d5   :  { %v1850_v59 = vpop.permute.xlu1 %1849 }
0x17d6   :  { %v1852_v12 = vmul.f32 %v1850_v59, %v1846_v58 }
0x17d8   :  { %1854 = vrot.lane.b32.xlu0 %v1852_v12, %s2556_s19 }
0x184a   :  { %v1855_v61 = vpop.permute.xlu0 %1854 }
0x184b   :  { %v1857_v62 = vadd.f32 %v1855_v61, %v1847_v60 }
0x184d   :  { %2491 = vtanh.f32 %v1857_v62 }
0x185a   :  { %v2492_v4 = vpop.eup %2491 }
0x185b   :  { %1860 = vrot.lane.b32.xlu1 %v2492_v4, %s2555_s0 }
0x18cd   :  { %v1861_v8 = vpop.permute.xlu1 %1860 }
0x18ce   :  { %v1863_v11 = vmul.f32 %v1861_v8, %v1846_v58 }
0x18d0   :  { %1869 = vrot.lane.b32.xlu0 %v1863_v11, %s2556_s19 }
0x1942   :  { %v1870_v13 = vpop.permute.xlu0 %1869 }
0x1943   :  { %2387 = vmatmul.mubr.msk.f32.vlgmr.msra.gmra.mxu0 %vm143_vm5, %v1870_v13 }
0x1a03   :  { %v1939_v16 = vpop.f32.mrf.mxu0 }
0x1a04   :  { %v1940_v9 = vadd.f32 %v2011_v15, %v1939_v16 }
0x1a05   :  { %v2388_v31 = vpop.f32.mrf.mxu0 }
0x1a06   :  { %1944 = vst.msk [vmem:[#allocation5] sm:$0x3] %vm1943_vm7, %v1940_v9 }
0x1a07   :  { %2537 = shalt.err (!%p2534_p9)
}
0x1a08   :  { %1954 = dma.vmem_to_hbm [thread:$0]  %s1952_s21, 32, %s3031_s2, [#allocation4]  }
0x1a09   :  { %2548 = dma.done.wait [#allocation4], 32  }
0x1a0a   :  { %2549 = vsyncadd [#allocation4], 4294967264 }
0x1a0b   :  { %1958 = vsyncpa [#allocation3], 1 }
0x1a0c   :  { %1959 = vsyncpa [#allocation4], 1 }

</bundles_post_ra>
